<compile_context>
chip_gen: v6e
topology: v6e:2x2x1
jax: 0.10.0
libtpu: 0.0.40
codegen_flags: <defaults>
</compile_context>

<pallas_src>
import math
from functools import partial

import jax
import jax.numpy as jnp
from jax.experimental import pallas as pl
from jax.experimental.pallas import tpu as pltpu


def _mha_kernel(q_ref, k_ref, v_ref, wq_ref, wk_ref, wv_ref, wo_ref, o_ref,
                *, head_num):
    B, Lq, F = q_ref.shape          # batch block, query length, in_features
    _, Lk, Dk = k_ref.shape         # key/value length, d_k
    H = head_num
    Dh = wq_ref.shape[-1]           # head_dim
    G = B * H                       # fused (batch, head) group axis
    f32 = jnp.float32

    # ---- Build (G, seq, feat) operands using ONLY leading-dim broadcasts and
    # ---- leading-dim reshapes (last two dims untouched -> no relayouts).
    q = q_ref[...]
    k = k_ref[...]
    v = v_ref[...]
    qg = jnp.broadcast_to(q[:, None], (B, H, Lq, F)).reshape(G, Lq, F)
    kg = jnp.broadcast_to(k[:, None], (B, H, Lk, Dk)).reshape(G, Lk, Dk)
    vg = jnp.broadcast_to(v[:, None], (B, H, Lk, Dk)).reshape(G, Lk, Dk)

    wq_g = jnp.broadcast_to(wq_ref[...][None], (B, H, F, Dh)).reshape(G, F, Dh)
    wk_g = jnp.broadcast_to(wk_ref[...][None], (B, H, Dk, Dh)).reshape(G, Dk, Dh)
    wv_g = jnp.broadcast_to(wv_ref[...][None], (B, H, Dk, Dh)).reshape(G, Dk, Dh)
    wo_g = jnp.broadcast_to(wo_ref[...][None], (B, H, Dh, F)).reshape(G, Dh, F)

    # ---- Head-batched projections (1/sqrt(Dh) already folded into wq_g).
    qh = jnp.einsum('gqf,gfd->gqd', qg, wq_g, preferred_element_type=f32)  # (G,Lq,Dh)
    kh = jnp.einsum('gkc,gcd->gkd', kg, wk_g, preferred_element_type=f32)  # (G,Lk,Dh)
    vh = jnp.einsum('gkc,gcd->gkd', vg, wv_g, preferred_element_type=f32)  # (G,Lk,Dh)

    # ---- Scaled-dot-product attention, batched over (batch, head) groups.
    s = jnp.einsum('gqd,gkd->gqk', qh, kh, preferred_element_type=f32)     # (G,Lq,Lk)
    m = jnp.max(s, axis=-1, keepdims=True)
    e = jnp.exp(s - m)                                                     # EUP
    denom = jnp.sum(e, axis=-1, keepdims=True)                             # (G,Lq,1)
    pv = jnp.einsum('gqk,gkd->gqd', e, vh, preferred_element_type=f32)     # (G,Lq,Dh)
    oh = pv * pl.reciprocal(denom, approx=False)                           # normalize post-matmul

    # ---- Fused output projection + reduction over heads (leading-dim sum).
    og = jnp.einsum('gqd,gdf->gqf', oh, wo_g, preferred_element_type=f32)  # (G,Lq,F)
    out = jnp.sum(og.reshape(B, H, Lq, F), axis=1)                         # (B,Lq,F)
    o_ref[...] = out.astype(o_ref.dtype)


def prepare_mha_params(params, *, head_num):
    """One-time weight preparation (do NOT call per step).

    Produces head-major layouts with 1/sqrt(head_dim) folded into wq:
      wq_h: (H, in_features, Dh)   wk_h/wv_h: (H, d_k, Dh)   wo_h: (H, Dh, in_features)
    """
    hdim, in_features = params["wq"].shape
    d_k = params["wk"].shape[1]
    head_dim = hdim // head_num
    scale = 1.0 / math.sqrt(head_dim)
    wq_h = jnp.transpose(params["wq"].reshape(head_num, head_dim, in_features),
                         (0, 2, 1)) * scale
    wk_h = jnp.transpose(params["wk"].reshape(head_num, head_dim, d_k), (0, 2, 1))
    wv_h = jnp.transpose(params["wv"].reshape(head_num, head_dim, d_k), (0, 2, 1))
    wo_h = params["wo"].T.reshape(head_num, head_dim, in_features)
    return {"wq_h": wq_h, "wk_h": wk_h, "wv_h": wv_h, "wo_h": wo_h}


def multi_head_attention(key, value, query, prepared, *, head_num, batch_block=None):
    """Pallas forward of MultiHeadAttention.forward(key, value, query)."""
    N, Lq, in_features = query.shape
    _, Lk, d_k = key.shape
    head_dim = in_features // head_num

    if batch_block is None:
        # Amortize per-grid-step overhead while keeping >=2 parallel grid
        # steps so both v7x TensorCores are used.
        batch_block = N // 2 if (N >= 2 and N % 2 == 0) else 1
    assert N % batch_block == 0, "batch_block must divide the batch size"
    B = batch_block

    kernel = partial(_mha_kernel, head_num=head_num)

    return pl.pallas_call(
        kernel,
        out_shape=jax.ShapeDtypeStruct((N, Lq, in_features), query.dtype),
        grid_spec=pltpu.PrefetchScalarGridSpec(
            num_scalar_prefetch=0,
            grid=(N // B,),
            in_specs=[
                pl.BlockSpec((B, Lq, in_features), lambda n: (n, 0, 0)),          # query
                pl.BlockSpec((B, Lk, d_k),         lambda n: (n, 0, 0)),          # key
                pl.BlockSpec((B, Lk, d_k),         lambda n: (n, 0, 0)),          # value
                pl.BlockSpec((head_num, in_features, head_dim), lambda n: (0, 0, 0)),  # wq_h (scaled)
                pl.BlockSpec((head_num, d_k, head_dim),         lambda n: (0, 0, 0)),  # wk_h
                pl.BlockSpec((head_num, d_k, head_dim),         lambda n: (0, 0, 0)),  # wv_h
                pl.BlockSpec((head_num, head_dim, in_features), lambda n: (0, 0, 0)),  # wo_h
            ],
            out_specs=pl.BlockSpec((B, Lq, in_features), lambda n: (n, 0, 0)),
        ),
        compiler_params=pltpu.CompilerParams(
            dimension_semantics=("parallel",)),
    )(query, key, value,
      prepared["wq_h"], prepared["wk_h"], prepared["wv_h"], prepared["wo_h"])


def _reference(key, value, query, params, *, head_num):
    """Pure-JAX reference matching the PyTorch forward exactly."""
    N, Lq, in_features = query.shape
    head_dim = in_features // head_num
    q = (query @ params["wq"].T).reshape(N, Lq, head_num, head_dim)
    k = (key   @ params["wk"].T).reshape(N, key.shape[1], head_num, head_dim)
    v = (value @ params["wv"].T).reshape(N, value.shape[1], head_num, head_dim)
    scores = jnp.einsum("nqhd,nkhd->nhqk", q, k) / math.sqrt(head_dim)
    attn = jax.nn.softmax(scores, axis=3)
    out = jnp.einsum("nhql,nlhd->nqhd", attn, v).reshape(N, Lq, head_num * head_dim)
    return out @ params["wo"].T


def _init_params(rng, in_features, head_num, d_k):
    """Deterministic init mimicking nn.Linear default U(-1/sqrt(fan_in), ...)."""
    head_dim = in_features // head_num
    hdim = head_num * head_dim
    keys = jax.random.split(rng, 4)

    def lin(k, out_f, in_f):
        bound = 1.0 / math.sqrt(in_f)
        return jax.random.uniform(k, (out_f, in_f), jnp.float32, -bound, bound)

    return {
        "wq": lin(keys[0], hdim, in_features),
        "wk": lin(keys[1], hdim, d_k),
        "wv": lin(keys[2], hdim, d_k),
        "wo": lin(keys[3], in_features, hdim),
    }


if __name__ == "__main__":
    # Small shapes consistent with the module; N=4 so batch blocking (2 per
    # step) and 2 parallel grid steps are both exercised.
    N, Lq, Lk = 4, 8, 8
    in_features, head_num, d_k = 32, 4, 64

    root = jax.random.PRNGKey(0)
    k_param, k_q, k_k, k_v = jax.random.split(root, 4)

    params = _init_params(k_param, in_features, head_num, d_k)
    query = jax.random.normal(k_q, (N, Lq, in_features), jnp.float32)
    key_t = jax.random.normal(k_k, (N, Lk, d_k), jnp.float32)
    value = jax.random.normal(k_v, (N, Lk, d_k), jnp.float32)

    prepared = prepare_mha_params(params, head_num=head_num)   # one-time weight prep

    out = multi_head_attention(key_t, value, query, prepared, head_num=head_num)
    out = jax.block_until_ready(out)

    ref = _reference(key_t, value, query, params, head_num=head_num)
    assert out.shape == (N, Lq, in_features)
    assert jnp.allclose(out, ref, atol=2e-5, rtol=2e-5), "mismatch vs reference"

    print("KERNEL_OK")
</pallas_src>

<mosaic_0001>
module attributes {stable_mosaic.version = 11 : i64} {
  func.func @_mha_kernel(%arg0: i32, %arg1: memref<2x8x32xf32, #tpu.memory_space<vmem>>, %arg2: memref<2x8x64xf32, #tpu.memory_space<vmem>>, %arg3: memref<2x8x64xf32, #tpu.memory_space<vmem>>, %arg4: memref<4x32x8xf32, #tpu.memory_space<vmem>>, %arg5: memref<4x64x8xf32, #tpu.memory_space<vmem>>, %arg6: memref<4x64x8xf32, #tpu.memory_space<vmem>>, %arg7: memref<4x8x32xf32, #tpu.memory_space<vmem>>, %arg8: memref<2x8x32xf32, #tpu.memory_space<vmem>>) attributes {dimension_semantics = [#tpu.dimension_semantics<parallel>], iteration_bounds = array<i64: 2>, scalar_prefetch = 0 : i64, scratch_operands = 0 : i64, tpu.core_type = #tpu.core_type<tc>, window_params = [{transform_indices = @transform_0, window_bounds = array<i64: 2, 8, 32>}, {transform_indices = @transform_1, window_bounds = array<i64: 2, 8, 64>}, {transform_indices = @transform_2, window_bounds = array<i64: 2, 8, 64>}, {pipeline_mode = #tpu.pipeline_mode<synchronous>, transform_indices = @transform_3, window_bounds = array<i64: 4, 32, 8>}, {pipeline_mode = #tpu.pipeline_mode<synchronous>, transform_indices = @transform_4, window_bounds = array<i64: 4, 64, 8>}, {pipeline_mode = #tpu.pipeline_mode<synchronous>, transform_indices = @transform_5, window_bounds = array<i64: 4, 64, 8>}, {pipeline_mode = #tpu.pipeline_mode<synchronous>, transform_indices = @transform_6, window_bounds = array<i64: 4, 8, 32>}, {transform_indices = @transform_7, window_bounds = array<i64: 2, 8, 32>}]} {
    %c0 = arith.constant 0 : index
    %c0_0 = arith.constant 0 : index
    %c0_1 = arith.constant 0 : index
    %0 = vector.load %arg1[%c0, %c0_0, %c0_1] : memref<2x8x32xf32, #tpu.memory_space<vmem>>, vector<2x8x32xf32>
    %c0_2 = arith.constant 0 : index
    %c0_3 = arith.constant 0 : index
    %c0_4 = arith.constant 0 : index
    %1 = vector.load %arg2[%c0_2, %c0_3, %c0_4] : memref<2x8x64xf32, #tpu.memory_space<vmem>>, vector<2x8x64xf32>
    %c0_5 = arith.constant 0 : index
    %c0_6 = arith.constant 0 : index
    %c0_7 = arith.constant 0 : index
    %2 = vector.load %arg3[%c0_5, %c0_6, %c0_7] : memref<2x8x64xf32, #tpu.memory_space<vmem>>, vector<2x8x64xf32>
    %3 = vector.shape_cast %0 : vector<2x8x32xf32> to vector<2x1x8x32xf32>
    %4 = vector.shape_cast %3 : vector<2x1x8x32xf32> to vector<2x1x8x32xf32>
    %5 = vector.broadcast %4 : vector<2x1x8x32xf32> to vector<2x4x8x32xf32>
    %6 = vector.shape_cast %5 : vector<2x4x8x32xf32> to vector<8x8x32xf32>
    %7 = vector.shape_cast %1 : vector<2x8x64xf32> to vector<2x1x8x64xf32>
    %8 = vector.shape_cast %7 : vector<2x1x8x64xf32> to vector<2x1x8x64xf32>
    %9 = vector.broadcast %8 : vector<2x1x8x64xf32> to vector<2x4x8x64xf32>
    %10 = vector.shape_cast %9 : vector<2x4x8x64xf32> to vector<8x8x64xf32>
    %11 = vector.shape_cast %2 : vector<2x8x64xf32> to vector<2x1x8x64xf32>
    %12 = vector.shape_cast %11 : vector<2x1x8x64xf32> to vector<2x1x8x64xf32>
    %13 = vector.broadcast %12 : vector<2x1x8x64xf32> to vector<2x4x8x64xf32>
    %14 = vector.shape_cast %13 : vector<2x4x8x64xf32> to vector<8x8x64xf32>
    %c0_8 = arith.constant 0 : index
    %c0_9 = arith.constant 0 : index
    %c0_10 = arith.constant 0 : index
    %15 = vector.load %arg4[%c0_8, %c0_9, %c0_10] : memref<4x32x8xf32, #tpu.memory_space<vmem>>, vector<4x32x8xf32>
    %16 = vector.shape_cast %15 : vector<4x32x8xf32> to vector<1x4x32x8xf32>
    %17 = vector.shape_cast %16 : vector<1x4x32x8xf32> to vector<1x4x32x8xf32>
    %18 = vector.broadcast %17 : vector<1x4x32x8xf32> to vector<2x4x32x8xf32>
    %19 = vector.shape_cast %18 : vector<2x4x32x8xf32> to vector<8x32x8xf32>
    %c0_11 = arith.constant 0 : index
    %c0_12 = arith.constant 0 : index
    %c0_13 = arith.constant 0 : index
    %20 = vector.load %arg5[%c0_11, %c0_12, %c0_13] : memref<4x64x8xf32, #tpu.memory_space<vmem>>, vector<4x64x8xf32>
    %21 = vector.shape_cast %20 : vector<4x64x8xf32> to vector<1x4x64x8xf32>
    %22 = vector.shape_cast %21 : vector<1x4x64x8xf32> to vector<1x4x64x8xf32>
    %23 = vector.broadcast %22 : vector<1x4x64x8xf32> to vector<2x4x64x8xf32>
    %24 = vector.shape_cast %23 : vector<2x4x64x8xf32> to vector<8x64x8xf32>
    %c0_14 = arith.constant 0 : index
    %c0_15 = arith.constant 0 : index
    %c0_16 = arith.constant 0 : index
    %25 = vector.load %arg6[%c0_14, %c0_15, %c0_16] : memref<4x64x8xf32, #tpu.memory_space<vmem>>, vector<4x64x8xf32>
    %26 = vector.shape_cast %25 : vector<4x64x8xf32> to vector<1x4x64x8xf32>
    %27 = vector.shape_cast %26 : vector<1x4x64x8xf32> to vector<1x4x64x8xf32>
    %28 = vector.broadcast %27 : vector<1x4x64x8xf32> to vector<2x4x64x8xf32>
    %29 = vector.shape_cast %28 : vector<2x4x64x8xf32> to vector<8x64x8xf32>
    %c0_17 = arith.constant 0 : index
    %c0_18 = arith.constant 0 : index
    %c0_19 = arith.constant 0 : index
    %30 = vector.load %arg7[%c0_17, %c0_18, %c0_19] : memref<4x8x32xf32, #tpu.memory_space<vmem>>, vector<4x8x32xf32>
    %31 = vector.shape_cast %30 : vector<4x8x32xf32> to vector<1x4x8x32xf32>
    %32 = vector.shape_cast %31 : vector<1x4x8x32xf32> to vector<1x4x8x32xf32>
    %33 = vector.broadcast %32 : vector<1x4x8x32xf32> to vector<2x4x8x32xf32>
    %34 = vector.shape_cast %33 : vector<2x4x8x32xf32> to vector<8x8x32xf32>
    "tpu.trace_start"() <{level = 10 : i32, message = "gqf,gfd->gqd"}> : () -> ()
    %cst = arith.constant dense<0.000000e+00> : vector<8x8x8xf32>
    %35 = tpu.matmul %6, %19, %cst {dimension_numbers = #tpu.dot_dimension_numbers<[2], [1], [1], [2], [0, 0, 0, 1, 1, 2], [0], [0]>} : vector<8x8x32xf32>, vector<8x32x8xf32>, vector<8x8x8xf32> -> vector<8x8x8xf32>
    "tpu.trace_stop"() : () -> ()
    "tpu.trace_start"() <{level = 10 : i32, message = "gkc,gcd->gkd"}> : () -> ()
    %cst_20 = arith.constant dense<0.000000e+00> : vector<8x8x8xf32>
    %36 = tpu.matmul %10, %24, %cst_20 {dimension_numbers = #tpu.dot_dimension_numbers<[2], [1], [1], [2], [0, 0, 0, 1, 1, 2], [0], [0]>} : vector<8x8x64xf32>, vector<8x64x8xf32>, vector<8x8x8xf32> -> vector<8x8x8xf32>
    %cst_21 = arith.constant dense<0.000000e+00> : vector<8x8x8xf32>
    %37 = tpu.matmul %14, %29, %cst_21 {dimension_numbers = #tpu.dot_dimension_numbers<[2], [1], [1], [2], [0, 0, 0, 1, 1, 2], [0], [0]>} : vector<8x8x64xf32>, vector<8x64x8xf32>, vector<8x8x8xf32> -> vector<8x8x8xf32>
    "tpu.trace_stop"() : () -> ()
    "tpu.trace_start"() <{level = 10 : i32, message = "gqd,gkd->gqk"}> : () -> ()
    %cst_22 = arith.constant dense<0.000000e+00> : vector<8x8x8xf32>
    %38 = tpu.matmul %35, %36, %cst_22 {dimension_numbers = #tpu.dot_dimension_numbers<[2], [2], [1], [1], [0, 0, 0, 1, 1, 1], [0], [0]>} : vector<8x8x8xf32>, vector<8x8x8xf32>, vector<8x8x8xf32> -> vector<8x8x8xf32>
    "tpu.trace_stop"() : () -> ()
    %cst_23 = arith.constant dense<0xFF800000> : vector<8x8xf32>
    %39 = vector.multi_reduction <maximumf>, %38, %cst_23 [2] : vector<8x8x8xf32> to vector<8x8xf32>
    %40 = vector.shape_cast %39 : vector<8x8xf32> to vector<8x8x1xf32>
    %41 = vector.broadcast %40 : vector<8x8x1xf32> to vector<8x8x8xf32>
    %42 = arith.subf %38, %41 : vector<8x8x8xf32>
    %43 = math.exp %42 : vector<8x8x8xf32>
    %cst_24 = arith.constant dense<0.000000e+00> : vector<8x8xf32>
    %44 = vector.multi_reduction <add>, %43, %cst_24 [2] : vector<8x8x8xf32> to vector<8x8xf32>
    %45 = vector.shape_cast %44 : vector<8x8xf32> to vector<8x8x1xf32>
    "tpu.trace_start"() <{level = 10 : i32, message = "gqk,gkd->gqd"}> : () -> ()
    %cst_25 = arith.constant dense<0.000000e+00> : vector<8x8x8xf32>
    %46 = tpu.matmul %43, %37, %cst_25 {dimension_numbers = #tpu.dot_dimension_numbers<[2], [1], [1], [2], [0, 0, 0, 1, 1, 2], [0], [0]>} : vector<8x8x8xf32>, vector<8x8x8xf32>, vector<8x8x8xf32> -> vector<8x8x8xf32>
    "tpu.trace_stop"() : () -> ()
    %47 = tpu.reciprocal %45 : vector<8x8x1xf32> -> vector<8x8x1xf32>
    %48 = vector.broadcast %47 : vector<8x8x1xf32> to vector<8x8x8xf32>
    %49 = arith.mulf %46, %48 : vector<8x8x8xf32>
    "tpu.trace_start"() <{level = 10 : i32, message = "gqd,gdf->gqf"}> : () -> ()
    %cst_26 = arith.constant dense<0.000000e+00> : vector<8x8x32xf32>
    %50 = tpu.matmul %49, %34, %cst_26 {dimension_numbers = #tpu.dot_dimension_numbers<[2], [1], [1], [2], [0, 0, 0, 1, 1, 2], [0], [0]>} : vector<8x8x8xf32>, vector<8x8x32xf32>, vector<8x8x32xf32> -> vector<8x8x32xf32>
    "tpu.trace_stop"() : () -> ()
    %51 = vector.shape_cast %50 : vector<8x8x32xf32> to vector<2x4x8x32xf32>
    %cst_27 = arith.constant dense<0.000000e+00> : vector<2x8x32xf32>
    %52 = vector.multi_reduction <add>, %51, %cst_27 [1] : vector<2x4x8x32xf32> to vector<2x8x32xf32>
    %c0_28 = arith.constant 0 : index
    %c0_29 = arith.constant 0 : index
    %c0_30 = arith.constant 0 : index
    %53 = vector.load %arg8[%c0_28, %c0_29, %c0_30] : memref<2x8x32xf32, #tpu.memory_space<vmem>>, vector<2x8x32xf32>
    tpu.vector_store %arg8[%c0_28, %c0_29, %c0_30], %52 {strides = array<i32>} : memref<2x8x32xf32, #tpu.memory_space<vmem>>, vector<2x8x32xf32>,
    return
  }
  func.func @transform_0(%arg0: i32) -> (i32, i32, i32) {
    %c0_i32 = arith.constant 0 : i32
    %c0_i32_0 = arith.constant 0 : i32
    %c0_i32_1 = arith.constant 0 : i32
    return %arg0, %c0_i32, %c0_i32_0 : i32, i32, i32
  }
  func.func @transform_1(%arg0: i32) -> (i32, i32, i32) {
    %c0_i32 = arith.constant 0 : i32
    %c0_i32_0 = arith.constant 0 : i32
    %c0_i32_1 = arith.constant 0 : i32
    return %arg0, %c0_i32, %c0_i32_0 : i32, i32, i32
  }
  func.func @transform_2(%arg0: i32) -> (i32, i32, i32) {
    %c0_i32 = arith.constant 0 : i32
    %c0_i32_0 = arith.constant 0 : i32
    %c0_i32_1 = arith.constant 0 : i32
    return %arg0, %c0_i32, %c0_i32_0 : i32, i32, i32
  }
  func.func @transform_3(%arg0: i32) -> (i32, i32, i32) {
    %c0_i32 = arith.constant 0 : i32
    %c0_i32_0 = arith.constant 0 : i32
    %c0_i32_1 = arith.constant 0 : i32
    %c0_i32_2 = arith.constant 0 : i32
    return %c0_i32, %c0_i32_0, %c0_i32_1 : i32, i32, i32
  }
  func.func @transform_4(%arg0: i32) -> (i32, i32, i32) {
    %c0_i32 = arith.constant 0 : i32
    %c0_i32_0 = arith.constant 0 : i32
    %c0_i32_1 = arith.constant 0 : i32
    %c0_i32_2 = arith.constant 0 : i32
    return %c0_i32, %c0_i32_0, %c0_i32_1 : i32, i32, i32
  }
  func.func @transform_5(%arg0: i32) -> (i32, i32, i32) {
    %c0_i32 = arith.constant 0 : i32
    %c0_i32_0 = arith.constant 0 : i32
    %c0_i32_1 = arith.constant 0 : i32
    %c0_i32_2 = arith.constant 0 : i32
    return %c0_i32, %c0_i32_0, %c0_i32_1 : i32, i32, i32
  }
  func.func @transform_6(%arg0: i32) -> (i32, i32, i32) {
    %c0_i32 = arith.constant 0 : i32
    %c0_i32_0 = arith.constant 0 : i32
    %c0_i32_1 = arith.constant 0 : i32
    %c0_i32_2 = arith.constant 0 : i32
    return %c0_i32, %c0_i32_0, %c0_i32_1 : i32, i32, i32
  }
  func.func @transform_7(%arg0: i32) -> (i32, i32, i32) {
    %c0_i32 = arith.constant 0 : i32
    %c0_i32_0 = arith.constant 0 : i32
    %c0_i32_1 = arith.constant 0 : i32
    return %arg0, %c0_i32, %c0_i32_0 : i32, i32, i32
  }
}

</mosaic_0001>

<bundles_post_ra>
// kernel: tpu_custom_call.1
= control target key start
LH: loop header
LB: loop body
LE: loop exit
PB: predicated region body
PF: predicated region fallthrough
CT: control target
= control target key end

     0   :  { %12 = vsyncpa [#allocation3], 0  ;;  %s6131_s0 = inlined_call_operand.vmem [shape: f32[4,8,32], index: 0, kind: input, shape index: {}]   ;;  %s6132_s1 = inlined_call_operand.vmem [shape: f32[4,8,64], index: 1, kind: input, shape index: {}]   ;;  %s6133_s2 = inlined_call_operand.vmem [shape: f32[4,8,64], index: 2, kind: input, shape index: {}]   ;;  %s6134_s3 = inlined_call_operand.vmem [shape: f32[4,32,8], index: 3, kind: input, shape index: {}]   ;;  %s6135_s4 = inlined_call_operand.vmem [shape: f32[4,64,8], index: 4, kind: input, shape index: {}]   ;;  %s6136_s5 = inlined_call_operand.vmem [shape: f32[4,64,8], index: 5, kind: input, shape index: {}]   ;;  %s6137_s6 = inlined_call_operand.vmem [shape: f32[4,8,32], index: 6, kind: input, shape index: {}]   ;;  %s6138_s7 = inlined_call_operand.hbm [shape: f32[4,8,32], index: 7, kind: output, shape index: {}]  }
   0x1   :  { %14 = vsyncpa [#allocation3 + $0x1], 0  ;;  %s5094_s24 = smov 0   ;;  %s5096_s25 = smov 0  }
   0x2   :  { %s5098_s26 = smov 0   ;;  %s5100_s27 = smov 0  }
   0x3 LB: > { %s5115_s28 = sadd.s32 4294967295, %s5047_s27   ;;  %s4095_s29 = sadd.s32 4294967294, %s5047_s27   ;;  %s5047_s27 = sphi %s5100_s27, %s6144_s27   ;;  %s5043_s26 = sphi %s5098_s26, %s6143_s26   ;;  %s5039_s25 = sphi %s5096_s25, %s6142_s25   ;;  %s5035_s24 = sphi %s5094_s24, %s6141_s24  }
   0x4   : > { %s5119_s30 = sadd.s32 1, %s5047_s27   ;;  %s189_s8 = sadd.s32 1, %s5043_s26 }
   0x5   : > { %s186_s9 = ssub.s32 %s5047_s27, %s5119_s30  ;;  %p199_p0 = scmp.ne.s32.totalorder %s5043_s26, %s5039_s25 }
   0x6   : > { %p187_p1 = scmp.eq.s32.totalorder %s186_s9, 0  ;;  %p200_p2 = scmp.eq.s32.totalorder %s5115_s28, 1 }
   0x7   : > { %p205_p3 = scmp.ne.s32.totalorder %s5039_s25, %s5035_s24  ;;  %p206_p4 = scmp.eq.s32.totalorder %s4095_s29, 1 }
   0x8   : > { %s5130_s10 = scalar_select %p187_p1, %s5043_s26, %s189_s8  }
   0x9   : > { %p5132_p5 = por %p200_p2, %p199_p0  ;;  %p5136_p6 = por %p206_p4, %p205_p3 }
   0xa   : > { %p4098_p7 = scmp.ge.s32.totalorder %s5047_s27, 1  ;;  %p263_p8 = scmp.lt.s32.totalorder %s5047_s27, 3 }
   0xc   : > { %p264_p9 = pnand %p4098_p7, %p263_p8 }
   0xd   : > { %s4100_s17 = sshll.u32 (!%p264_p9), %s5115_s28, 1  ;;  %s4167_s9 = sshll.u32 (!%p264_p9), %s5115_s28, 8 }
   0xe   : > { %267 = sbr.rel (%p264_p9) target bundleno = 1085 (0x43d), region = 48  ;;  %p306_p10 = scmp.lt.s32.totalorder (!%p264_p9), %s4100_s17, 3 }
   0xf   : > { %s6086_s15 = scalar_lea.hbm (!%p264_p9), %s6138_s7, %s4167_s9  ;;  %s5051_s18 = smov (!%p264_p9), [#allocation2]  }
  0x10   : > { %s4991_s19 = sshll.u32 (!%p264_p9), %s5051_s18, 4  ;;  %s4992_s19 = int_to_ptr.vmem [resolvable:$false] %s4991_s19 }
  0x13   : > { %v5145_v0 = vld [vmem:[%s6134_s3 + $0x18] sm:$0xff]  ;;  %v5049_v2 = vmov 0.0   ;;  %v5158_v3 = vld [vmem:[%s6134_s3 + $0x10] sm:$0xff]  ;;  %v331_v5 = vld [vmem:[%s6134_s3 + $0x8] sm:$0xff]  ;;  %s6146_s17 = smov (!%p306_p10, %s4100_s17), 3  ;;  %vm414_vm0 = vcmask 261120  }
  0x14   : > { %v5150_v1 = vld [vmem:[%s6134_s3 + $0x38] sm:$0xff]  ;;  %4400 = vmatprep.subr.mxu0 %v5049_v2  ;;  %4411 = vmatprep.subr.mxu1 %v5049_v2  ;;  %v5163_v4 = vld [vmem:[%s6134_s3 + $0x30] sm:$0xff]  ;;  %v335_v6 = vld [vmem:[%s6134_s3 + $0x28] sm:$0xff]  ;;  %s5182_s14 = sshll.u32 %s6146_s17, 3  ;;  %vm5050_vm1 = vmmov 0   ;;  %vm981_vm2 = vcmask 523264  }
  0x15   : > { %4401 = vmatpush3.msra.mxu0 %v5145_v0  ;;  %4412 = vmatpush3.msra.mxu1 %v5150_v1  ;;  %v330_v7 = vld [vmem:[%s6134_s3] sm:$0xff]  ;;  %s5191_s20 = scalar_lea.vmem %s6131_s0, %s5182_s14  ;;  %v341_v10 = vld [vmem:[%s6134_s3 + $0x58] sm:$0xff]  ;;  %v340_v12 = vld [vmem:[%s6134_s3 + $0x50] sm:$0xff]  ;;  %s5371_s13 = scalar_lea.vmem %s6132_s1, %s5182_s14  ;;  %vm2114_vm3 = vcmask 64512  }
  0x16   : > { %4402 = vmatprep.subr.mxu0 %v5049_v2  ;;  %4413 = vmatprep.subr.mxu1 %v5049_v2  ;;  %v334_v8 = vld [vmem:[%s6134_s3 + $0x20] sm:$0xff]  ;;  %v345_v11 = vld [vmem:[%s6134_s3 + $0x78] sm:$0xff]  ;;  %v344_v13 = vld [vmem:[%s6134_s3 + $0x70] sm:$0xff]  ;;  %s5703_s23 = scalar_lea.vmem %s6133_s2, %s5182_s14  ;;  %s302_s14 = sand.u32 1, %s5039_s25  }
  0x17   : > { %4403 = vmatpush3.msra.mxu0 %v5158_v3  ;;  %4414 = vmatpush3.msra.mxu1 %v5163_v4  ;;  %v324_v9 = vld [vmem:[%s5191_s20] sm:$0xff]  ;;  %v339_v14 = vld [vmem:[%s6134_s3 + $0x48] sm:$0xff]  ;;  %v5273_v19 = vld [vmem:[%s6135_s4 + $0x38] sm:$0xff]  ;;  %s6091_s28 = scalar_lea.sflag [#allocation3], %s302_s14  ;;  %s4993_s17 = scalar_lea.vmem %s4992_s19, 512 }
  0x18   : > { %4404 = vmatprep.subr.mxu0 %v5049_v2  ;;  %4415 = vmatprep.subr.mxu1 %v5049_v2  ;;  %v343_v15 = vld [vmem:[%s6134_s3 + $0x68] sm:$0xff]  ;;  %v338_v16 = vld [vmem:[%s6134_s3 + $0x40] sm:$0xff]  ;;  %v5278_v20 = vld [vmem:[%s6135_s4 + $0x78] sm:$0xff] }
  0x19   : > { %4405 = vmatpush3.msra.mxu0 %v331_v5  ;;  %4416 = vmatpush3.msra.mxu1 %v335_v6  ;;  %v342_v17 = vld [vmem:[%s6134_s3 + $0x60] sm:$0xff]  ;;  %v325_v18 = vld [vmem:[%s5191_s20 + $0x8] sm:$0xff]  ;;  %v5288_v21 = vld [vmem:[%s6135_s4 + $0x30] sm:$0xff]  ;;  %s4099_s20 = sshll.u32 %s302_s14, 4 }
  0x1a   : > { %4406 = vmatprep.subr.mxu0 %v5049_v2  ;;  %4417 = vmatprep.subr.mxu1 %v5049_v2  ;;  %v5293_v22 = vld [vmem:[%s6135_s4 + $0x70] sm:$0xff]  ;;  %v5302_v23 = vld [vmem:[%s6135_s4 + $0x28] sm:$0xff]  ;;  %v5316_v25 = vld [vmem:[%s6135_s4 + $0x20] sm:$0xff]  ;;  %s304_s29 = scalar_lea.vmem [#allocation2], %s4099_s20 }
  0x1b   : > { %4407 = vmatpush3.msra.mxu0 %v330_v7  ;;  %4408 = vmatprep.mubr.msk.f32.mxu0 %vm5050_vm1, %v5049_v2  ;;  %v5307_v24 = vld [vmem:[%s6135_s4 + $0x68] sm:$0xff]  ;;  %v5321_v26 = vld [vmem:[%s6135_s4 + $0x60] sm:$0xff]  ;;  %v5330_v27 = vld [vmem:[%s6135_s4 + $0x18] sm:$0xff]  ;;  %s4009_s8 = sshll.u32 %s304_s29, 4  ;;  %s6080_s8 = int_to_ptr.vmem [resolvable:$true] %s4009_s8 }
  0x1c   : > { %4418 = vmatpush3.msra.mxu1 %v334_v8  ;;  %4409 = vmatmul.mubr.msk.f32.vlgmr.msra.gmra.mxu0 %vm414_vm0, %v324_v9  ;;  %v5335_v28 = vld [vmem:[%s6135_s4 + $0x58] sm:$0xff]  ;;  %v5344_v29 = vld [vmem:[%s6135_s4 + $0x10] sm:$0xff]  ;;  %v5358_v31 = vld [vmem:[%s6135_s4 + $0x8] sm:$0xff]  ;;  %s4987_s16 = scalar_lea.vmem %s6080_s8, 256  ;;  %p4994_p0 = scmp.lt.s32.totalorder %s6080_s8, %s4992_s19 }
  0x1d   : > { %4419 = vmatprep.mubr.msk.f32.mxu1 %vm5050_vm1, %v5049_v2  ;;  %4422 = vmatprep.subr.mxu0 %v5049_v2  ;;  %v5349_v30 = vld [vmem:[%s6135_s4 + $0x50] sm:$0xff]  ;;  %v5363_v32 = vld [vmem:[%s6135_s4 + $0x48] sm:$0xff]  ;;  %v5378_v33 = vld [vmem:[%s6135_s4] sm:$0xff]  ;;  %p4988_p11 = scmp.ne.s32.totalorder %s6080_s8, %s4987_s16  ;;  %p4995_p1 = scmp.lt.s32.totalorder %s4993_s17, %s4987_s16 }
  0x1e   : > { %4433 = vmatprep.subr.mxu1 %v5049_v2  ;;  %4420 = vmatmul.mubr.msk.f32.vlgmr.msra.gmra.mxu1 %vm414_vm0, %v324_v9  ;;  %v5385_v34 = vld [vmem:[%s6135_s4 + $0x40] sm:$0xff]  ;;  %v5399_v36 = vld [vmem:[%s6135_s4 + $0xb8] sm:$0xff]  ;;  %v5413_v38 = vld [vmem:[%s6135_s4 + $0xb0] sm:$0xff] }
  0x1f   : > { %4423 = vmatpush3.msra.mxu0 %v341_v10  ;;  %4434 = vmatpush3.msra.mxu1 %v345_v11  ;;  %v326_v35 = vld [vmem:[%s5371_s13] sm:$0xff]  ;;  %v5404_v37 = vld [vmem:[%s6135_s4 + $0xf8] sm:$0xff]  ;;  %v5418_v39 = vld [vmem:[%s6135_s4 + $0xf0] sm:$0xff]  ;;  %p4989_p12 = pnand %p4988_p11, %p5132_p5  ;;  %p4996_p2 = por %p4995_p1, %p4994_p0 }
  0x20   : > { %4424 = vmatprep.subr.mxu0 %v5049_v2  ;;  %4435 = vmatprep.subr.mxu1 %v5049_v2  ;;  %v5427_v40 = vld [vmem:[%s6135_s4 + $0xa8] sm:$0xff]  ;;  %v5441_v42 = vld [vmem:[%s6135_s4 + $0xa0] sm:$0xff]  ;;  %v5455_v44 = vld [vmem:[%s6135_s4 + $0x98] sm:$0xff] }
  0x21   : > { %4425 = vmatpush3.msra.mxu0 %v340_v12  ;;  %4436 = vmatpush3.msra.mxu1 %v344_v13  ;;  %v5432_v41 = vld [vmem:[%s6135_s4 + $0xe8] sm:$0xff]  ;;  %v5446_v43 = vld [vmem:[%s6135_s4 + $0xe0] sm:$0xff]  ;;  %v5460_v45 = vld [vmem:[%s6135_s4 + $0xd8] sm:$0xff]  ;;  %p4990_p13 = pneg %p4989_p12 }
  0x22   : > { %4426 = vmatprep.subr.mxu0 %v5049_v2  ;;  %4437 = vmatprep.subr.mxu1 %v5049_v2  ;;  %v5469_v46 = vld [vmem:[%s6135_s4 + $0x90] sm:$0xff]  ;;  %v5483_v48 = vld [vmem:[%s6135_s4 + $0x88] sm:$0xff]  ;;  %v5497_v50 = vld [vmem:[%s6135_s4 + $0x80] sm:$0xff] }
  0x23   : > { %4427 = vmatpush3.msra.mxu0 %v339_v14  ;;  %4438 = vmatpush3.msra.mxu1 %v343_v15  ;;  %v5474_v47 = vld [vmem:[%s6135_s4 + $0xd0] sm:$0xff]  ;;  %v5488_v49 = vld [vmem:[%s6135_s4 + $0xc8] sm:$0xff]  ;;  %v5504_v51 = vld [vmem:[%s6135_s4 + $0xc0] sm:$0xff]  ;;  %p4997_p3 = pnand %p4996_p2, %p4990_p13 }
  0x24   : > { %4428 = vmatprep.subr.mxu0 %v5049_v2  ;;  %4439 = vmatprep.subr.mxu1 %v5049_v2  ;;  %v327_v52 = vld [vmem:[%s5371_s13 + $0x8] sm:$0xff]  ;;  %v5594_v53 = vld [vmem:[%s6136_s5 + $0x38] sm:$0xff]  ;;  %v5608_v55 = vld [vmem:[%s6136_s5 + $0x30] sm:$0xff] }
  0x25   : > { %4429 = vmatpush3.msra.mxu0 %v338_v16  ;;  %4430 = vmatprep.mubr.msk.f32.mxu0 %vm5050_vm1, %v5049_v2  ;;  %v5599_v54 = vld [vmem:[%s6136_s5 + $0x78] sm:$0xff]  ;;  %v5613_v56 = vld [vmem:[%s6136_s5 + $0x70] sm:$0xff]  ;;  %v5622_v57 = vld [vmem:[%s6136_s5 + $0x28] sm:$0xff] }
  0x26   : > { %4440 = vmatpush3.msra.mxu1 %v342_v17  ;;  %4431 = vmatmul.mubr.msk.f32.vlgmr.msra.gmra.mxu0 %vm414_vm0, %v324_v9  ;;  %v5627_v58 = vld [vmem:[%s6136_s5 + $0x68] sm:$0xff]  ;;  %v5636_v59 = vld [vmem:[%s6136_s5 + $0x20] sm:$0xff]  ;;  %v5650_v61 = vld [vmem:[%s6136_s5 + $0x18] sm:$0xff] }
  0x27   : > { %4441 = vmatprep.mubr.msk.f32.mxu1 %vm5050_vm1, %v5049_v2  ;;  %4444 = vmatprep.subr.mxu0 %v5049_v2  ;;  %v5641_v60 = vld [vmem:[%s6136_s5 + $0x60] sm:$0xff]  ;;  %v5655_v62 = vld [vmem:[%s6136_s5 + $0x58] sm:$0xff]  ;;  %v5664_v63 = vld [vmem:[%s6136_s5 + $0x10] sm:$0xff] }
  0x28   : > { %4455 = vmatprep.subr.mxu1 %v5049_v2  ;;  %4442 = vmatmul.mubr.msk.f32.vlgmr.msra.gmra.mxu1 %vm414_vm0, %v324_v9  ;;  %v5733_v9 = vld [vmem:[%s6136_s5 + $0xb0] sm:$0xff] }
  0x29   : > { %4445 = vmatpush3.msra.mxu0 %v5145_v0  ;;  %4456 = vmatpush3.msra.mxu1 %v5150_v1  ;;  %v5669_v0 = vld [vmem:[%s6136_s5 + $0x50] sm:$0xff]  ;;  %v5678_v1 = vld [vmem:[%s6136_s5 + $0x8] sm:$0xff] }
  0x2a   : > { %4446 = vmatprep.subr.mxu0 %v5049_v2  ;;  %4457 = vmatprep.subr.mxu1 %v5049_v2 }
  0x2b   : > { %4447 = vmatpush3.msra.mxu0 %v5158_v3  ;;  %4458 = vmatpush3.msra.mxu1 %v5163_v4  ;;  %v5683_v3 = vld [vmem:[%s6136_s5 + $0x48] sm:$0xff]  ;;  %v5692_v4 = vld [vmem:[%s6136_s5] sm:$0xff] }
  0x2c   : > { %4448 = vmatprep.subr.mxu0 %v5049_v2  ;;  %4459 = vmatprep.subr.mxu1 %v5049_v2 }
  0x2d   : > { %4449 = vmatpush3.msra.mxu0 %v331_v5  ;;  %4460 = vmatpush3.msra.mxu1 %v335_v6  ;;  %v5697_v5 = vld [vmem:[%s6136_s5 + $0x40] sm:$0xff] }
  0x2e   : > { %4450 = vmatprep.subr.mxu0 %v5049_v2  ;;  %4461 = vmatprep.subr.mxu1 %v5049_v2  ;;  %v328_v6 = vld [vmem:[%s5703_s23] sm:$0xff] }
  0x2f   : > { %4451 = vmatpush3.msra.mxu0 %v330_v7  ;;  %4452 = vmatprep.mubr.msk.f32.mxu0 %vm5050_vm1, %v5049_v2  ;;  %v5719_v7 = vld [vmem:[%s6136_s5 + $0xb8] sm:$0xff] }
  0x30   : > { %4462 = vmatpush3.msra.mxu1 %v334_v8  ;;  %4453 = vmatmul.mubr.msk.f32.vlgmr.msra.gmra.mxu0 %vm414_vm0, %v325_v18  ;;  %v5724_v8 = vld [vmem:[%s6136_s5 + $0xf8] sm:$0xff] }
  0x31   : > { %4463 = vmatprep.mubr.msk.f32.mxu1 %vm5050_vm1, %v5049_v2  ;;  %4466 = vmatprep.subr.mxu0 %v5049_v2 }
  0x32   : > { %4477 = vmatprep.subr.mxu1 %v5049_v2  ;;  %4464 = vmatmul.mubr.msk.f32.vlgmr.msra.gmra.mxu1 %vm414_vm0, %v325_v18 }
  0x33   : > { %4467 = vmatpush3.msra.mxu0 %v341_v10  ;;  %4478 = vmatpush3.msra.mxu1 %v345_v11  ;;  %v5738_v10 = vld [vmem:[%s6136_s5 + $0xf0] sm:$0xff]  ;;  %v5747_v11 = vld [vmem:[%s6136_s5 + $0xa8] sm:$0xff] }
  0x34   : > { %4468 = vmatprep.subr.mxu0 %v5049_v2  ;;  %4479 = vmatprep.subr.mxu1 %v5049_v2 }
  0x35   : > { %4469 = vmatpush3.msra.mxu0 %v340_v12  ;;  %4480 = vmatpush3.msra.mxu1 %v344_v13  ;;  %v5752_v12 = vld [vmem:[%s6136_s5 + $0xe8] sm:$0xff]  ;;  %v5761_v13 = vld [vmem:[%s6136_s5 + $0xa0] sm:$0xff] }
  0x36   : > { %4470 = vmatprep.subr.mxu0 %v5049_v2  ;;  %4481 = vmatprep.subr.mxu1 %v5049_v2 }
  0x37   : > { %4471 = vmatpush3.msra.mxu0 %v339_v14  ;;  %4482 = vmatpush3.msra.mxu1 %v343_v15  ;;  %v5766_v14 = vld [vmem:[%s6136_s5 + $0xe0] sm:$0xff]  ;;  %v5775_v15 = vld [vmem:[%s6136_s5 + $0x98] sm:$0xff] }
  0x38   : > { %4472 = vmatprep.subr.mxu0 %v5049_v2  ;;  %4483 = vmatprep.subr.mxu1 %v5049_v2 }
  0x39   : > { %4473 = vmatpush3.msra.mxu0 %v338_v16  ;;  %4474 = vmatprep.mubr.msk.f32.mxu0 %vm5050_vm1, %v5049_v2  ;;  %v5780_v16 = vld [vmem:[%s6136_s5 + $0xd8] sm:$0xff] }
  0x3a   : > { %4484 = vmatpush3.msra.mxu1 %v342_v17  ;;  %4475 = vmatmul.mubr.msk.f32.vlgmr.msra.gmra.mxu0 %vm414_vm0, %v325_v18  ;;  %v5789_v17 = vld [vmem:[%s6136_s5 + $0x90] sm:$0xff] }
  0x3b   : > { %4485 = vmatprep.mubr.msk.f32.mxu1 %vm5050_vm1, %v5049_v2  ;;  %4488 = vmatprep.subr.mxu0 %v5049_v2 }
  0x3c   : > { %4507 = vmatprep.subr.mxu1 %v5049_v2  ;;  %4486 = vmatmul.mubr.msk.f32.vlgmr.msra.gmra.mxu1 %vm414_vm0, %v325_v18  ;;  %v5794_v18 = vld [vmem:[%s6136_s5 + $0xd0] sm:$0xff] }
  0x3d   : > { %4489 = vmatpush3.msra.mxu0 %v5273_v19  ;;  %4508 = vmatpush3.msra.mxu1 %v5278_v20 }
  0x3e   : > { %4490 = vmatprep.subr.mxu0 %v5049_v2  ;;  %4509 = vmatprep.subr.mxu1 %v5049_v2 }
  0x3f   : > { %4491 = vmatpush3.msra.mxu0 %v5288_v21  ;;  %4510 = vmatpush3.msra.mxu1 %v5293_v22 }
  0x40   : > { %4492 = vmatprep.subr.mxu0 %v5049_v2  ;;  %4511 = vmatprep.subr.mxu1 %v5049_v2 }
  0x41   : > { %4493 = vmatpush3.msra.mxu0 %v5302_v23  ;;  %4512 = vmatpush3.msra.mxu1 %v5307_v24 }
  0x42   : > { %4494 = vmatprep.subr.mxu0 %v5049_v2  ;;  %4513 = vmatprep.subr.mxu1 %v5049_v2 }
  0x43   : > { %4495 = vmatpush3.msra.mxu0 %v5316_v25  ;;  %4514 = vmatpush3.msra.mxu1 %v5321_v26 }
  0x44   : > { %4496 = vmatprep.subr.mxu0 %v5049_v2  ;;  %4515 = vmatprep.subr.mxu1 %v5049_v2 }
  0x45   : > { %4497 = vmatpush3.msra.mxu0 %v5330_v27  ;;  %4516 = vmatpush3.msra.mxu1 %v5335_v28 }
  0x46   : > { %4498 = vmatprep.subr.mxu0 %v5049_v2  ;;  %4517 = vmatprep.subr.mxu1 %v5049_v2 }
  0x47   : > { %4499 = vmatpush3.msra.mxu0 %v5344_v29  ;;  %4518 = vmatpush3.msra.mxu1 %v5349_v30 }
  0x48   : > { %4500 = vmatprep.subr.mxu0 %v5049_v2  ;;  %4519 = vmatprep.subr.mxu1 %v5049_v2 }
  0x49   : > { %4501 = vmatpush3.msra.mxu0 %v5358_v31  ;;  %4520 = vmatpush3.msra.mxu1 %v5363_v32 }
  0x4a   : > { %4502 = vmatprep.subr.mxu0 %v5049_v2  ;;  %4521 = vmatprep.subr.mxu1 %v5049_v2 }
  0x4b   : > { %4503 = vmatpush3.msra.mxu0 %v5378_v33  ;;  %4504 = vmatprep.mubr.msk.f32.mxu0 %vm5050_vm1, %v5049_v2 }
  0x4c   : > { %4522 = vmatpush3.msra.mxu1 %v5385_v34  ;;  %4523 = vmatprep.mubr.msk.f32.mxu1 %vm5050_vm1, %v5049_v2 }
  0x4d   : > { %4505 = vmatmul.mubr.msk.f32.vlgmr.msra.gmra.mxu0 %vm981_vm2, %v326_v35  ;;  %4524 = vmatmul.mubr.msk.f32.vlgmr.msra.gmra.mxu1 %vm981_vm2, %v326_v35 }
  0x4e   : > { %4526 = vmatprep.subr.mxu0 %v5049_v2  ;;  %4545 = vmatprep.subr.mxu1 %v5049_v2 }
  0x4f   : > { %4527 = vmatpush3.msra.mxu0 %v5399_v36  ;;  %4546 = vmatpush3.msra.mxu1 %v5404_v37 }
  0x50   : > { %4528 = vmatprep.subr.mxu0 %v5049_v2  ;;  %4547 = vmatprep.subr.mxu1 %v5049_v2 }
  0x51   : > { %4529 = vmatpush3.msra.mxu0 %v5413_v38  ;;  %4548 = vmatpush3.msra.mxu1 %v5418_v39 }
  0x52   : > { %4530 = vmatprep.subr.mxu0 %v5049_v2  ;;  %4549 = vmatprep.subr.mxu1 %v5049_v2 }
  0x53   : > { %4531 = vmatpush3.msra.mxu0 %v5427_v40  ;;  %4550 = vmatpush3.msra.mxu1 %v5432_v41 }
  0x54   : > { %4532 = vmatprep.subr.mxu0 %v5049_v2  ;;  %4551 = vmatprep.subr.mxu1 %v5049_v2 }
  0x55   : > { %4533 = vmatpush3.msra.mxu0 %v5441_v42  ;;  %4552 = vmatpush3.msra.mxu1 %v5446_v43 }
  0x56   : > { %4534 = vmatprep.subr.mxu0 %v5049_v2  ;;  %4553 = vmatprep.subr.mxu1 %v5049_v2 }
  0x57   : > { %4535 = vmatpush3.msra.mxu0 %v5455_v44  ;;  %4554 = vmatpush3.msra.mxu1 %v5460_v45 }
  0x58   : > { %4536 = vmatprep.subr.mxu0 %v5049_v2  ;;  %4555 = vmatprep.subr.mxu1 %v5049_v2 }
  0x59   : > { %4537 = vmatpush3.msra.mxu0 %v5469_v46  ;;  %4556 = vmatpush3.msra.mxu1 %v5474_v47 }
  0x5a   : > { %4538 = vmatprep.subr.mxu0 %v5049_v2  ;;  %4557 = vmatprep.subr.mxu1 %v5049_v2 }
  0x5b   : > { %4539 = vmatpush3.msra.mxu0 %v5483_v48  ;;  %4558 = vmatpush3.msra.mxu1 %v5488_v49 }
  0x5c   : > { %4540 = vmatprep.subr.mxu0 %v5049_v2  ;;  %4559 = vmatprep.subr.mxu1 %v5049_v2 }
  0x5d   : > { %4541 = vmatpush3.msra.mxu0 %v5497_v50  ;;  %4542 = vmatprep.mubr.msk.f32.mxu0 %vm5050_vm1, %v5049_v2 }
  0x5e   : > { %4560 = vmatpush3.msra.mxu1 %v5504_v51  ;;  %4561 = vmatprep.mubr.msk.f32.mxu1 %vm5050_vm1, %v5049_v2 }
  0x5f   : > { %4543 = vmatmul.mubr.msk.f32.vlgmr.msra.gmra.mxu0 %vm981_vm2, %v326_v35  ;;  %4562 = vmatmul.mubr.msk.f32.vlgmr.msra.gmra.mxu1 %vm981_vm2, %v326_v35 }
  0x60   : > { %4564 = vmatprep.subr.mxu0 %v5049_v2  ;;  %4583 = vmatprep.subr.mxu1 %v5049_v2 }
  0x61   : > { %4565 = vmatpush3.msra.mxu0 %v5273_v19  ;;  %4584 = vmatpush3.msra.mxu1 %v5278_v20  ;;  %v5803_v19 = vld [vmem:[%s6136_s5 + $0x88] sm:$0xff] }
  0x62   : > { %4566 = vmatprep.subr.mxu0 %v5049_v2  ;;  %4585 = vmatprep.subr.mxu1 %v5049_v2  ;;  %v5808_v20 = vld [vmem:[%s6136_s5 + $0xc8] sm:$0xff] }
  0x63   : > { %4567 = vmatpush3.msra.mxu0 %v5288_v21  ;;  %4586 = vmatpush3.msra.mxu1 %v5293_v22  ;;  %v5817_v21 = vld [vmem:[%s6136_s5 + $0x80] sm:$0xff] }
  0x64   : > { %4568 = vmatprep.subr.mxu0 %v5049_v2  ;;  %4587 = vmatprep.subr.mxu1 %v5049_v2  ;;  %v5822_v22 = vld [vmem:[%s6136_s5 + $0xc0] sm:$0xff] }
  0x65   : > { %4569 = vmatpush3.msra.mxu0 %v5302_v23  ;;  %4588 = vmatpush3.msra.mxu1 %v5307_v24  ;;  %v329_v23 = vld [vmem:[%s5703_s23 + $0x8] sm:$0xff] }
  0x66   : > { %4570 = vmatprep.subr.mxu0 %v5049_v2  ;;  %4589 = vmatprep.subr.mxu1 %v5049_v2 }
  0x67   : > { %4571 = vmatpush3.msra.mxu0 %v5316_v25  ;;  %4590 = vmatpush3.msra.mxu1 %v5321_v26 }
  0x68   : > { %4572 = vmatprep.subr.mxu0 %v5049_v2  ;;  %4591 = vmatprep.subr.mxu1 %v5049_v2 }
  0x69   : > { %4573 = vmatpush3.msra.mxu0 %v5330_v27  ;;  %4592 = vmatpush3.msra.mxu1 %v5335_v28 }
  0x6a   : > { %4574 = vmatprep.subr.mxu0 %v5049_v2  ;;  %4593 = vmatprep.subr.mxu1 %v5049_v2 }
  0x6b   : > { %4575 = vmatpush3.msra.mxu0 %v5344_v29  ;;  %4594 = vmatpush3.msra.mxu1 %v5349_v30 }
  0x6c   : > { %4576 = vmatprep.subr.mxu0 %v5049_v2  ;;  %4595 = vmatprep.subr.mxu1 %v5049_v2 }
  0x6d   : > { %4577 = vmatpush3.msra.mxu0 %v5358_v31  ;;  %4596 = vmatpush3.msra.mxu1 %v5363_v32 }
  0x6e   : > { %4578 = vmatprep.subr.mxu0 %v5049_v2  ;;  %4597 = vmatprep.subr.mxu1 %v5049_v2 }
  0x6f   : > { %4579 = vmatpush3.msra.mxu0 %v5378_v33  ;;  %4580 = vmatprep.mubr.msk.f32.mxu0 %vm5050_vm1, %v5049_v2 }
  0x70   : > { %4598 = vmatpush3.msra.mxu1 %v5385_v34  ;;  %4599 = vmatprep.mubr.msk.f32.mxu1 %vm5050_vm1, %v5049_v2 }
  0x71   : > { %4581 = vmatmul.mubr.msk.f32.vlgmr.msra.gmra.mxu0 %vm981_vm2, %v327_v52  ;;  %4600 = vmatmul.mubr.msk.f32.vlgmr.msra.gmra.mxu1 %vm981_vm2, %v327_v52 }
  0x72   : > { %4602 = vmatprep.subr.mxu0 %v5049_v2  ;;  %4621 = vmatprep.subr.mxu1 %v5049_v2 }
  0x73   : > { %4603 = vmatpush3.msra.mxu0 %v5399_v36  ;;  %4622 = vmatpush3.msra.mxu1 %v5404_v37 }
  0x74   : > { %4604 = vmatprep.subr.mxu0 %v5049_v2  ;;  %4623 = vmatprep.subr.mxu1 %v5049_v2 }
  0x75   : > { %4605 = vmatpush3.msra.mxu0 %v5413_v38  ;;  %4624 = vmatpush3.msra.mxu1 %v5418_v39 }
  0x76   : > { %4606 = vmatprep.subr.mxu0 %v5049_v2  ;;  %4625 = vmatprep.subr.mxu1 %v5049_v2 }
  0x77   : > { %4607 = vmatpush3.msra.mxu0 %v5427_v40  ;;  %4626 = vmatpush3.msra.mxu1 %v5432_v41 }
  0x78   : > { %4608 = vmatprep.subr.mxu0 %v5049_v2  ;;  %4627 = vmatprep.subr.mxu1 %v5049_v2 }
  0x79   : > { %4609 = vmatpush3.msra.mxu0 %v5441_v42  ;;  %4628 = vmatpush3.msra.mxu1 %v5446_v43 }
  0x7a   : > { %4610 = vmatprep.subr.mxu0 %v5049_v2  ;;  %4629 = vmatprep.subr.mxu1 %v5049_v2 }
  0x7b   : > { %4611 = vmatpush3.msra.mxu0 %v5455_v44  ;;  %4630 = vmatpush3.msra.mxu1 %v5460_v45 }
  0x7c   : > { %4612 = vmatprep.subr.mxu0 %v5049_v2  ;;  %4631 = vmatprep.subr.mxu1 %v5049_v2 }
  0x7d   : > { %4613 = vmatpush3.msra.mxu0 %v5469_v46  ;;  %4632 = vmatpush3.msra.mxu1 %v5474_v47 }
  0x7e   : > { %4614 = vmatprep.subr.mxu0 %v5049_v2  ;;  %4633 = vmatprep.subr.mxu1 %v5049_v2 }
  0x7f   : > { %4615 = vmatpush3.msra.mxu0 %v5483_v48  ;;  %4634 = vmatpush3.msra.mxu1 %v5488_v49 }
  0x80   : > { %4616 = vmatprep.subr.mxu0 %v5049_v2  ;;  %4635 = vmatprep.subr.mxu1 %v5049_v2 }
  0x81   : > { %4617 = vmatpush3.msra.mxu0 %v5497_v50  ;;  %4618 = vmatprep.mubr.msk.f32.mxu0 %vm5050_vm1, %v5049_v2 }
  0x82   : > { %4636 = vmatpush3.msra.mxu1 %v5504_v51  ;;  %4637 = vmatprep.mubr.msk.f32.mxu1 %vm5050_vm1, %v5049_v2 }
  0x83   : > { %4619 = vmatmul.mubr.msk.f32.vlgmr.msra.gmra.mxu0 %vm981_vm2, %v327_v52  ;;  %4638 = vmatmul.mubr.msk.f32.vlgmr.msra.gmra.mxu1 %vm981_vm2, %v327_v52 }
  0x84   : > { %4640 = vmatprep.subr.mxu0 %v5049_v2  ;;  %4659 = vmatprep.subr.mxu1 %v5049_v2 }
  0x85   : > { %4641 = vmatpush3.msra.mxu0 %v5594_v53  ;;  %4660 = vmatpush3.msra.mxu1 %v5599_v54 }
  0x86   : > { %4642 = vmatprep.subr.mxu0 %v5049_v2  ;;  %4661 = vmatprep.subr.mxu1 %v5049_v2 }
  0x87   : > { %4643 = vmatpush3.msra.mxu0 %v5608_v55  ;;  %4662 = vmatpush3.msra.mxu1 %v5613_v56 }
  0x88   : > { %4644 = vmatprep.subr.mxu0 %v5049_v2  ;;  %4663 = vmatprep.subr.mxu1 %v5049_v2 }
  0x89   : > { %4645 = vmatpush3.msra.mxu0 %v5622_v57  ;;  %4664 = vmatpush3.msra.mxu1 %v5627_v58 }
  0x8a   : > { %4646 = vmatprep.subr.mxu0 %v5049_v2  ;;  %4665 = vmatprep.subr.mxu1 %v5049_v2 }
  0x8b   : > { %4647 = vmatpush3.msra.mxu0 %v5636_v59  ;;  %4666 = vmatpush3.msra.mxu1 %v5641_v60 }
  0x8c   : > { %4648 = vmatprep.subr.mxu0 %v5049_v2  ;;  %4667 = vmatprep.subr.mxu1 %v5049_v2 }
  0x8d   : > { %4649 = vmatpush3.msra.mxu0 %v5650_v61  ;;  %4668 = vmatpush3.msra.mxu1 %v5655_v62 }
  0x8e   : > { %4650 = vmatprep.subr.mxu0 %v5049_v2  ;;  %4669 = vmatprep.subr.mxu1 %v5049_v2 }
  0x8f   : > { %4651 = vmatpush3.msra.mxu0 %v5664_v63  ;;  %4670 = vmatpush3.msra.mxu1 %v5669_v0 }
  0x90   : > { %4652 = vmatprep.subr.mxu0 %v5049_v2  ;;  %4671 = vmatprep.subr.mxu1 %v5049_v2 }
  0x91   : > { %4653 = vmatpush3.msra.mxu0 %v5678_v1  ;;  %4672 = vmatpush3.msra.mxu1 %v5683_v3 }
  0x92   : > { %4654 = vmatprep.subr.mxu0 %v5049_v2  ;;  %4673 = vmatprep.subr.mxu1 %v5049_v2 }
  0x93   : > { %4655 = vmatpush3.msra.mxu0 %v5692_v4  ;;  %4674 = vmatpush3.msra.mxu1 %v5697_v5 }
  0x94   : > { %4656 = vmatprep.mubr.msk.f32.mxu0 %vm5050_vm1, %v5049_v2  ;;  %4675 = vmatprep.mubr.msk.f32.mxu1 %vm5050_vm1, %v5049_v2 }
  0x95   : > { %4678 = vmatprep.subr.mxu0 %v5049_v2  ;;  %4697 = vmatprep.subr.mxu1 %v5049_v2 }
  0x96   : > { %4657 = vmatmul.mubr.msk.f32.vlgmr.msra.gmra.mxu0 %vm981_vm2, %v328_v6  ;;  %4676 = vmatmul.mubr.msk.f32.vlgmr.msra.gmra.mxu1 %vm981_vm2, %v328_v6 }
  0x97   : > { %4679 = vmatpush3.msra.mxu0 %v5719_v7  ;;  %4698 = vmatpush3.msra.mxu1 %v5724_v8 }
  0x98   : > { %4680 = vmatprep.subr.mxu0 %v5049_v2  ;;  %4699 = vmatprep.subr.mxu1 %v5049_v2 }
  0x99   : > { %4681 = vmatpush3.msra.mxu0 %v5733_v9  ;;  %4700 = vmatpush3.msra.mxu1 %v5738_v10 }
  0x9a   : > { %4682 = vmatprep.subr.mxu0 %v5049_v2  ;;  %4701 = vmatprep.subr.mxu1 %v5049_v2 }
  0x9b   : > { %4683 = vmatpush3.msra.mxu0 %v5747_v11  ;;  %4702 = vmatpush3.msra.mxu1 %v5752_v12 }
  0x9c   : > { %4684 = vmatprep.subr.mxu0 %v5049_v2  ;;  %4703 = vmatprep.subr.mxu1 %v5049_v2 }
  0x9d   : > { %4685 = vmatpush3.msra.mxu0 %v5761_v13  ;;  %4704 = vmatpush3.msra.mxu1 %v5766_v14 }
  0x9e   : > { %4686 = vmatprep.subr.mxu0 %v5049_v2  ;;  %4705 = vmatprep.subr.mxu1 %v5049_v2 }
  0x9f   : > { %4687 = vmatpush3.msra.mxu0 %v5775_v15  ;;  %4706 = vmatpush3.msra.mxu1 %v5780_v16 }
  0xa0   : > { %4688 = vmatprep.subr.mxu0 %v5049_v2  ;;  %4707 = vmatprep.subr.mxu1 %v5049_v2 }
  0xa1   : > { %4689 = vmatpush3.msra.mxu0 %v5789_v17  ;;  %4708 = vmatpush3.msra.mxu1 %v5794_v18 }
  0xa2   : > { %4690 = vmatprep.subr.mxu0 %v5049_v2  ;;  %4709 = vmatprep.subr.mxu1 %v5049_v2 }
  0xa3   : > { %4691 = vmatpush3.msra.mxu0 %v5803_v19  ;;  %4710 = vmatpush3.msra.mxu1 %v5808_v20 }
  0xa4   : > { %4692 = vmatprep.subr.mxu0 %v5049_v2  ;;  %4711 = vmatprep.subr.mxu1 %v5049_v2 }
  0xa5   : > { %4693 = vmatpush3.msra.mxu0 %v5817_v21  ;;  %4712 = vmatpush3.msra.mxu1 %v5822_v22 }
  0xa6   : > { %4694 = vmatprep.mubr.msk.f32.mxu0 %vm5050_vm1, %v5049_v2  ;;  %4713 = vmatprep.mubr.msk.f32.mxu1 %vm5050_vm1, %v5049_v2 }
  0xa7   : > { %4716 = vmatprep.subr.mxu0 %v5049_v2  ;;  %4735 = vmatprep.subr.mxu1 %v5049_v2 }
  0xa8   : > { %4695 = vmatmul.mubr.msk.f32.vlgmr.msra.gmra.mxu0 %vm981_vm2, %v328_v6  ;;  %4714 = vmatmul.mubr.msk.f32.vlgmr.msra.gmra.mxu1 %vm981_vm2, %v328_v6 }
  0xa9   : > { %4717 = vmatpush3.msra.mxu0 %v5594_v53  ;;  %4736 = vmatpush3.msra.mxu1 %v5599_v54 }
  0xaa   : > { %4718 = vmatprep.subr.mxu0 %v5049_v2  ;;  %4737 = vmatprep.subr.mxu1 %v5049_v2 }
  0xab   : > { %4719 = vmatpush3.msra.mxu0 %v5608_v55  ;;  %4738 = vmatpush3.msra.mxu1 %v5613_v56 }
  0xac   : > { %4720 = vmatprep.subr.mxu0 %v5049_v2  ;;  %4739 = vmatprep.subr.mxu1 %v5049_v2 }
  0xad   : > { %4721 = vmatpush3.msra.mxu0 %v5622_v57  ;;  %4740 = vmatpush3.msra.mxu1 %v5627_v58 }
  0xae   : > { %4722 = vmatprep.subr.mxu0 %v5049_v2  ;;  %4741 = vmatprep.subr.mxu1 %v5049_v2 }
  0xaf   : > { %4723 = vmatpush3.msra.mxu0 %v5636_v59  ;;  %4742 = vmatpush3.msra.mxu1 %v5641_v60 }
  0xb0   : > { %4724 = vmatprep.subr.mxu0 %v5049_v2  ;;  %4743 = vmatprep.subr.mxu1 %v5049_v2 }
  0xb1   : > { %4725 = vmatpush3.msra.mxu0 %v5650_v61  ;;  %4744 = vmatpush3.msra.mxu1 %v5655_v62 }
  0xb2   : > { %4726 = vmatprep.subr.mxu0 %v5049_v2  ;;  %4745 = vmatprep.subr.mxu1 %v5049_v2 }
  0xb3   : > { %4727 = vmatpush3.msra.mxu0 %v5664_v63  ;;  %4746 = vmatpush3.msra.mxu1 %v5669_v0 }
  0xb4   : > { %4728 = vmatprep.subr.mxu0 %v5049_v2  ;;  %4747 = vmatprep.subr.mxu1 %v5049_v2 }
  0xb5   : > { %4729 = vmatpush3.msra.mxu0 %v5678_v1  ;;  %4748 = vmatpush3.msra.mxu1 %v5683_v3 }
  0xb6   : > { %4730 = vmatprep.subr.mxu0 %v5049_v2  ;;  %4749 = vmatprep.subr.mxu1 %v5049_v2 }
  0xb7   : > { %4731 = vmatpush3.msra.mxu0 %v5692_v4  ;;  %4750 = vmatpush3.msra.mxu1 %v5697_v5 }
  0xb8   : > { %4732 = vmatprep.mubr.msk.f32.mxu0 %vm5050_vm1, %v5049_v2  ;;  %4751 = vmatprep.mubr.msk.f32.mxu1 %vm5050_vm1, %v5049_v2 }
  0xb9   : > { %4754 = vmatprep.subr.mxu0 %v5049_v2  ;;  %4773 = vmatprep.subr.mxu1 %v5049_v2 }
  0xba   : > { %4733 = vmatmul.mubr.msk.f32.vlgmr.msra.gmra.mxu0 %vm981_vm2, %v329_v23  ;;  %4752 = vmatmul.mubr.msk.f32.vlgmr.msra.gmra.mxu1 %vm981_vm2, %v329_v23 }
  0xbb   : > { %4755 = vmatpush3.msra.mxu0 %v5719_v7  ;;  %4774 = vmatpush3.msra.mxu1 %v5724_v8 }
  0xbc   : > { %4756 = vmatprep.subr.mxu0 %v5049_v2  ;;  %4775 = vmatprep.subr.mxu1 %v5049_v2 }
  0xbd   : > { %4757 = vmatpush3.msra.mxu0 %v5733_v9  ;;  %4776 = vmatpush3.msra.mxu1 %v5738_v10 }
  0xbe   : > { %4758 = vmatprep.subr.mxu0 %v5049_v2  ;;  %4777 = vmatprep.subr.mxu1 %v5049_v2 }
  0xbf   : > { %4759 = vmatpush3.msra.mxu0 %v5747_v11  ;;  %4778 = vmatpush3.msra.mxu1 %v5752_v12 }
  0xc0   : > { %4760 = vmatprep.subr.mxu0 %v5049_v2  ;;  %4779 = vmatprep.subr.mxu1 %v5049_v2 }
  0xc1   : > { %4761 = vmatpush3.msra.mxu0 %v5761_v13  ;;  %4780 = vmatpush3.msra.mxu1 %v5766_v14 }
  0xc2   : > { %4762 = vmatprep.subr.mxu0 %v5049_v2  ;;  %4781 = vmatprep.subr.mxu1 %v5049_v2 }
  0xc3   : > { %4763 = vmatpush3.msra.mxu0 %v5775_v15  ;;  %4782 = vmatpush3.msra.mxu1 %v5780_v16 }
  0xc4   : > { %4764 = vmatprep.subr.mxu0 %v5049_v2  ;;  %4783 = vmatprep.subr.mxu1 %v5049_v2 }
  0xc5   : > { %4765 = vmatpush3.msra.mxu0 %v5789_v17  ;;  %4784 = vmatpush3.msra.mxu1 %v5794_v18 }
  0xc6   : > { %4766 = vmatprep.subr.mxu0 %v5049_v2  ;;  %4785 = vmatprep.subr.mxu1 %v5049_v2 }
  0xc7   : > { %4767 = vmatpush3.msra.mxu0 %v5803_v19  ;;  %4786 = vmatpush3.msra.mxu1 %v5808_v20 }
  0xc8   : > { %4768 = vmatprep.subr.mxu0 %v5049_v2  ;;  %4787 = vmatprep.subr.mxu1 %v5049_v2 }
  0xc9   : > { %4769 = vmatpush3.msra.mxu0 %v5817_v21  ;;  %4770 = vmatprep.mubr.msk.f32.mxu0 %vm5050_vm1, %v5049_v2 }
  0xca   : > { %4788 = vmatpush3.msra.mxu1 %v5822_v22  ;;  %4789 = vmatprep.mubr.msk.f32.mxu1 %vm5050_vm1, %v5049_v2 }
  0xcb   : > { %4771 = vmatmul.mubr.msk.f32.vlgmr.msra.gmra.mxu0 %vm981_vm2, %v329_v23  ;;  %4790 = vmatmul.mubr.msk.f32.vlgmr.msra.gmra.mxu1 %vm981_vm2, %v329_v23 }
  0xcc   : > { %4792 = vmatprep.subr.mxu0 %v5049_v2  ;;  %4797 = vmatprep.subr.mxu1 %v5049_v2 }
  0xcd   : > { %4794 = vmatprep.mubr.msk.f32.mxu0 %vm5050_vm1, %v5049_v2  ;;  %4799 = vmatprep.mubr.msk.f32.mxu1 %vm5050_vm1, %v5049_v2 }
  0xdc   : > { %v484_v24 = vpop.f32.mrf.mxu0 }
  0xde   : > { %v554_v25 = vpop.f32.mrf.mxu1  ;;  %v4410_v26 = vpop.f32.mrf.mxu0 }
  0xe0   : > { %v4421_v27 = vpop.f32.mrf.mxu1 }
  0xe6   : > { %v624_v28 = vpop.f32.mrf.mxu0 }
  0xe8   : > { %v694_v29 = vpop.f32.mrf.mxu1  ;;  %v4432_v30 = vpop.f32.mrf.mxu0 }
  0xea   : > { %v4443_v31 = vpop.f32.mrf.mxu1 }
  0xf0   : > { %v767_v32 = vpop.f32.mrf.mxu0 }
  0xf2   : > { %v837_v33 = vpop.f32.mrf.mxu1  ;;  %v4454_v34 = vpop.f32.mrf.mxu0 }
  0xf4   : > { %v4465_v35 = vpop.f32.mrf.mxu1 }
  0xfa   : > { %v907_v36 = vpop.f32.mrf.mxu0 }
  0xfc   : > { %v977_v37 = vpop.f32.mrf.mxu1  ;;  %v4476_v38 = vpop.f32.mrf.mxu0 }
  0xfe   : > { %v4487_v39 = vpop.f32.mrf.mxu1 }
 0x10d   : > { %v1051_v40 = vpop.f32.mrf.mxu0  ;;  %v1121_v41 = vpop.f32.mrf.mxu1 }
 0x10e   : > { %4793 = vmatpush3.xpose.msk.msra.mxu0 %vm2114_vm3, %v1051_v40  ;;  %4798 = vmatpush3.xpose.msk.msra.mxu1 %vm2114_vm3, %v1121_v41 }
 0x10f   : > { %v4506_v42 = vpop.f32.mrf.mxu0  ;;  %v4525_v43 = vpop.f32.mrf.mxu1  ;;  %4802 = vmatprep.subr.mxu0 %v5049_v2  ;;  %4807 = vmatprep.subr.mxu1 %v5049_v2 }
 0x111   : > { %4795 = vmatmul.mubr.msk.f32.vlgmr.msra.gmra.mxu0 %vm2114_vm3, %v484_v24  ;;  %4800 = vmatmul.mubr.msk.f32.vlgmr.msra.gmra.mxu1 %vm2114_vm3, %v554_v25 }
 0x112   : > { %4804 = vmatprep.mubr.msk.f32.mxu0 %vm5050_vm1, %v5049_v2  ;;  %4809 = vmatprep.mubr.msk.f32.mxu1 %vm5050_vm1, %v5049_v2 }
 0x11f   : > { %v1191_v44 = vpop.f32.mrf.mxu0  ;;  %v1261_v45 = vpop.f32.mrf.mxu1 }
 0x120   : > { %4803 = vmatpush3.xpose.msk.msra.mxu0 %vm2114_vm3, %v1191_v44  ;;  %4808 = vmatpush3.xpose.msk.msra.mxu1 %vm2114_vm3, %v1261_v45 }
 0x121   : > { %v4544_v46 = vpop.f32.mrf.mxu0  ;;  %v4563_v47 = vpop.f32.mrf.mxu1  ;;  %4812 = vmatprep.subr.mxu0 %v5049_v2  ;;  %4817 = vmatprep.subr.mxu1 %v5049_v2 }
 0x123   : > { %4805 = vmatmul.mubr.msk.f32.vlgmr.msra.gmra.mxu0 %vm2114_vm3, %v624_v28  ;;  %4810 = vmatmul.mubr.msk.f32.vlgmr.msra.gmra.mxu1 %vm2114_vm3, %v694_v29 }
 0x124   : > { %4814 = vmatprep.mubr.msk.f32.mxu0 %vm5050_vm1, %v5049_v2  ;;  %4819 = vmatprep.mubr.msk.f32.mxu1 %vm5050_vm1, %v5049_v2 }
 0x131   : > { %v1334_v48 = vpop.f32.mrf.mxu0  ;;  %v1404_v49 = vpop.f32.mrf.mxu1 }
 0x132   : > { %4813 = vmatpush3.xpose.msk.msra.mxu0 %vm2114_vm3, %v1334_v48  ;;  %4818 = vmatpush3.xpose.msk.msra.mxu1 %vm2114_vm3, %v1404_v49 }
 0x133   : > { %v4582_v50 = vpop.f32.mrf.mxu0  ;;  %v4601_v51 = vpop.f32.mrf.mxu1  ;;  %4822 = vmatprep.subr.mxu0 %v5049_v2  ;;  %4827 = vmatprep.subr.mxu1 %v5049_v2 }
 0x135   : > { %4815 = vmatmul.mubr.msk.f32.vlgmr.msra.gmra.mxu0 %vm2114_vm3, %v767_v32  ;;  %4820 = vmatmul.mubr.msk.f32.vlgmr.msra.gmra.mxu1 %vm2114_vm3, %v837_v33 }
 0x136   : > { %4824 = vmatprep.mubr.msk.f32.mxu0 %vm5050_vm1, %v5049_v2  ;;  %4829 = vmatprep.mubr.msk.f32.mxu1 %vm5050_vm1, %v5049_v2 }
 0x143   : > { %v1474_v52 = vpop.f32.mrf.mxu0  ;;  %v1544_v53 = vpop.f32.mrf.mxu1 }
 0x144   : > { %4823 = vmatpush3.xpose.msk.msra.mxu0 %vm2114_vm3, %v1474_v52  ;;  %4828 = vmatpush3.xpose.msk.msra.mxu1 %vm2114_vm3, %v1544_v53 }
 0x145   : > { %v4620_v54 = vpop.f32.mrf.mxu0  ;;  %v4639_v55 = vpop.f32.mrf.mxu1  ;;  %4832 = vmatprep.subr.mxu0 %v5049_v2  ;;  %4837 = vmatprep.subr.mxu1 %v5049_v2 }
 0x147   : > { %4825 = vmatmul.mubr.msk.f32.vlgmr.msra.gmra.mxu0 %vm2114_vm3, %v907_v36  ;;  %4830 = vmatmul.mubr.msk.f32.vlgmr.msra.gmra.mxu1 %vm2114_vm3, %v977_v37 }
 0x148   : > { %4834 = vmatprep.mubr.msk.f32.mxu0 %vm5050_vm1, %v5049_v2  ;;  %4839 = vmatprep.mubr.msk.f32.mxu1 %vm5050_vm1, %v5049_v2 }
 0x156   : > { %v1617_v56 = vpop.f32.mrf.mxu0  ;;  %v1687_v57 = vpop.f32.mrf.mxu1 }
 0x157   : > { %4833 = vmatpush3.msra.mxu0 %v1617_v56  ;;  %4838 = vmatpush3.msra.mxu1 %v1687_v57 }
 0x158   : > { %v4658_v58 = vpop.f32.mrf.mxu0  ;;  %v4677_v59 = vpop.f32.mrf.mxu1  ;;  %4842 = vmatprep.subr.mxu0 %v5049_v2  ;;  %4847 = vmatprep.subr.mxu1 %v5049_v2 }
 0x168   : > { %v1757_v60 = vpop.f32.mrf.mxu0  ;;  %v5961_v61 = vpop.f32.mrf.mxu1 }
 0x16a   : > { %v4696_v62 = vpop.f32.mrf.mxu0  ;;  %v4715_v63 = vpop.f32.mrf.mxu1 }
 0x17a   : > { %v5963_v0 = vpop.f32.mrf.mxu0  ;;  %v5965_v1 = vpop.f32.mrf.mxu1 }
 0x17c   : > { %v4734_v3 = vpop.f32.mrf.mxu0  ;;  %v4753_v4 = vpop.f32.mrf.mxu1 }
 0x18b   : > { %v5967_v5 = vpop.f32.mrf.mxu0  ;;  %v5969_v6 = vpop.f32.mrf.mxu1 }
 0x18d   : > { %v4772_v7 = vpop.f32.mrf.mxu0  ;;  %v4791_v8 = vpop.f32.mrf.mxu1 }
 0x1d1   : > { %v2187_v9 = vpop.f32.mrf.mxu0  ;;  %v2263_v10 = vpop.f32.mrf.mxu1 }
 0x1d2   : > { %v2723_v11 = vsel %vm2114_vm3, %v2187_v9, -inf  ;;  %v2726_v14 = vsel %vm2114_vm3, %v2263_v10, -inf }
 0x1d3   : > { %v4801_v12 = vpop.f32.mrf.mxu1  ;;  %2724 = vmax.xlane.f32.xlu0 %v2723_v11  ;;  %v4796_v13 = vpop.f32.mrf.mxu0  ;;  %v411_v11 = vld [vmem:[%s6137_s6 + $0x8] sm:$0xff] }
 0x1d7   : > { %2727 = vmax.xlane.f32.xlu0 %v2726_v14 }
 0x1e3   : > { %v2339_v15 = vpop.f32.mrf.mxu0  ;;  %v2415_v16 = vpop.f32.mrf.mxu1 }
 0x1e4   : > { %v2729_v17 = vsel %vm2114_vm3, %v2339_v15, -inf  ;;  %v2732_v20 = vsel %vm2114_vm3, %v2415_v16, -inf }
 0x1e5   : > { %v4811_v18 = vpop.f32.mrf.mxu1  ;;  %2730 = vmax.xlane.f32.xlu1 %v2729_v17  ;;  %v4806_v19 = vpop.f32.mrf.mxu0  ;;  %v412_v17 = vld [vmem:[%s6137_s6 + $0x10] sm:$0xff] }
 0x1e9   : > { %2733 = vmax.xlane.f32.xlu1 %v2732_v20 }
 0x1f5   : > { %v2491_v21 = vpop.f32.mrf.mxu0  ;;  %v2567_v22 = vpop.f32.mrf.mxu1 }
 0x1f6   : > { %v2738_v23 = vsel %vm2114_vm3, %v2567_v22, -inf  ;;  %v2735_v24 = vsel %vm2114_vm3, %v2491_v21, -inf }
 0x1f7   : > { %v4821_v25 = vpop.f32.mrf.mxu1  ;;  %2739 = vmax.xlane.f32.xlu1 %v2738_v23  ;;  %2736 = vmax.xlane.f32.xlu0 %v2735_v24  ;;  %v4816_v26 = vpop.f32.mrf.mxu0  ;;  %v413_v23 = vld [vmem:[%s6137_s6 + $0x18] sm:$0xff] }
 0x207   : > { %v5977_v27 = vpop.f32.mrf.mxu0  ;;  %v5979_v28 = vpop.f32.mrf.mxu1 }
 0x208   : > { %v2744_v29 = vsel %vm2114_vm3, %v5979_v28, -inf  ;;  %v2741_v30 = vsel %vm2114_vm3, %v5977_v27, -inf }
 0x209   : > { %v4831_v31 = vpop.f32.mrf.mxu1  ;;  %2745 = vmax.xlane.f32.xlu1 %v2744_v29  ;;  %2742 = vmax.xlane.f32.xlu0 %v2741_v30  ;;  %v4826_v32 = vpop.f32.mrf.mxu0 }
 0x25c   : > { %v2725_v33 = vpop.xlane.xlu0 %2724 }
 0x25d   : > { %v2747_v34 = vsub.f32 %v2187_v9, %v2725_v33 }
 0x25f   : > { %v2755_v35 = vmul.f32 1.442695, %v2747_v34 }
 0x260   : > { %v2728_v36 = vpop.xlane.xlu0 %2727 }
 0x261   : > { %4955 = vpow2.f32 %v2755_v35  ;;  %v2748_v37 = vsub.f32 %v2263_v10, %v2728_v36  ;;  %v410_v10 = vld [vmem:[%s6137_s6] sm:$0xff] }
 0x263   : > { %v2757_v38 = vmul.f32 1.442695, %v2748_v37 }
 0x265   : > { %4957 = vpow2.f32 %v2757_v38 }
 0x26e   : > { %v4956_v39 = vpop.eup %4955  ;;  %v2731_v40 = vpop.xlane.xlu1 %2730 }
 0x26f   : > { %v2749_v41 = vsub.f32 %v2339_v15, %v2731_v40  ;;  %4835 = vmatmul.mubr.msk.f32.vlgmr.msra.gmra.mxu0 %vm2114_vm3, %v4956_v39  ;;  %v2771_v42 = vsel %vm2114_vm3, %v4956_v39, 0.0 }
 0x270   : > { %4843 = vmatpush3.msra.mxu0 %v1757_v60  ;;  %2772 = vadd.xlane.f32.xlu0 %v2771_v42 }
 0x271   : > { %v2759_v43 = vmul.f32 1.442695, %v2749_v41  ;;  %4844 = vmatprep.mubr.msk.f32.mxu0 %vm5050_vm1, %v5049_v2  ;;  %4852 = vmatprep.subr.mxu0 %v5049_v2 }
 0x272   : > { %v4958_v44 = vpop.eup %4957  ;;  %v2734_v45 = vpop.xlane.xlu1 %2733 }
 0x273   : > { %4959 = vpow2.f32 %v2759_v43  ;;  %v2750_v46 = vsub.f32 %v2415_v16, %v2734_v45  ;;  %4840 = vmatmul.mubr.msk.f32.vlgmr.msra.gmra.mxu1 %vm2114_vm3, %v4958_v44  ;;  %v2774_v47 = vsel %vm2114_vm3, %v4958_v44, 0.0 }
 0x274   : > { %4848 = vmatpush3.msra.mxu1 %v5961_v61  ;;  %2775 = vadd.xlane.f32.xlu1 %v2774_v47 }
 0x275   : > { %v2761_v48 = vmul.f32 1.442695, %v2750_v46  ;;  %4849 = vmatprep.mubr.msk.f32.mxu1 %vm5050_vm1, %v5049_v2  ;;  %4857 = vmatprep.subr.mxu1 %v5049_v2 }
 0x277   : > { %4961 = vpow2.f32 %v2761_v48 }
 0x280   : > { %v4960_v49 = vpop.eup %4959  ;;  %v2740_v50 = vpop.xlane.xlu1 %2739 }
 0x281   : > { %v2737_v51 = vpop.xlane.xlu0 %2736  ;;  %v2752_v52 = vsub.f32 %v2567_v22, %v2740_v50  ;;  %4845 = vmatmul.mubr.msk.f32.vlgmr.msra.gmra.mxu0 %vm2114_vm3, %v4960_v49  ;;  %v2777_v54 = vsel %vm2114_vm3, %v4960_v49, 0.0 }
 0x282   : > { %v2751_v53 = vsub.f32 %v2491_v21, %v2737_v51  ;;  %4853 = vmatpush3.msra.mxu0 %v5963_v0  ;;  %2778 = vadd.xlane.f32.xlu0 %v2777_v54 }
 0x283   : > { %v2765_v55 = vmul.f32 1.442695, %v2752_v52  ;;  %4854 = vmatprep.mubr.msk.f32.mxu0 %vm5050_vm1, %v5049_v2  ;;  %4862 = vmatprep.subr.mxu0 %v5049_v2 }
 0x284   : > { %v2763_v56 = vmul.f32 1.442695, %v2751_v53  ;;  %v4962_v57 = vpop.eup %4961 }
 0x285   : > { %4963 = vpow2.f32 %v2765_v55  ;;  %4850 = vmatmul.mubr.msk.f32.vlgmr.msra.gmra.mxu1 %vm2114_vm3, %v4962_v57  ;;  %v2780_v58 = vsel %vm2114_vm3, %v4962_v57, 0.0 }
 0x286   : > { %4965 = vpow2.f32 %v2763_v56  ;;  %4858 = vmatpush3.msra.mxu1 %v5965_v1  ;;  %2781 = vadd.xlane.f32.xlu1 %v2780_v58 }
 0x287   : > { %4859 = vmatprep.mubr.msk.f32.mxu1 %vm5050_vm1, %v5049_v2  ;;  %4867 = vmatprep.subr.mxu1 %v5049_v2 }
 0x292   : > { %v4964_v59 = vpop.eup %4963  ;;  %v2746_v60 = vpop.xlane.xlu1 %2745 }
 0x293   : > { %v2743_v61 = vpop.xlane.xlu0 %2742  ;;  %v4966_v62 = vpop.eup %4965  ;;  %v2754_v63 = vsub.f32 %v5979_v28, %v2746_v60  ;;  %4860 = vmatmul.mubr.msk.f32.vlgmr.msra.gmra.mxu1 %vm2114_vm3, %v4964_v59  ;;  %v2786_v3 = vsel %vm2114_vm3, %v4964_v59, 0.0 }
 0x294   : > { %v2753_v0 = vsub.f32 %v5977_v27, %v2743_v61  ;;  %4855 = vmatmul.mubr.msk.f32.vlgmr.msra.gmra.mxu0 %vm2114_vm3, %v4966_v62  ;;  %4868 = vmatpush3.msra.mxu1 %v5969_v6  ;;  %v2783_v1 = vsel %vm2114_vm3, %v4966_v62, 0.0 }
 0x295   : > { %v2769_v4 = vmul.f32 1.442695, %v2754_v63  ;;  %4863 = vmatpush3.msra.mxu0 %v5967_v5  ;;  %2787 = vadd.xlane.f32.xlu1 %v2786_v3 }
 0x296   : > { %v2767_v7 = vmul.f32 1.442695, %v2753_v0  ;;  %2784 = vadd.xlane.f32.xlu0 %v2783_v1  ;;  %4864 = vmatprep.mubr.msk.f32.mxu0 %vm5050_vm1, %v5049_v2 }
 0x297   : > { %4967 = vpow2.f32 %v2769_v4  ;;  %4869 = vmatprep.mubr.msk.f32.mxu1 %vm5050_vm1, %v5049_v2  ;;  %4872 = vmatprep.subr.mxu0 %v5049_v2 }
 0x298   : > { %4969 = vpow2.f32 %v2767_v7  ;;  %4877 = vmatprep.subr.mxu1 %v5049_v2 }
 0x2a4   : > { %v4968_v6 = vpop.eup %4967 }
 0x2a5   : > { %v4970_v8 = vpop.eup %4969  ;;  %4870 = vmatmul.mubr.msk.f32.vlgmr.msra.gmra.mxu1 %vm2114_vm3, %v4968_v6  ;;  %v2792_v5 = vsel %vm2114_vm3, %v4968_v6, 0.0 }
 0x2a6   : > { %4865 = vmatmul.mubr.msk.f32.vlgmr.msra.gmra.mxu0 %vm2114_vm3, %v4970_v8  ;;  %2793 = vadd.xlane.f32.xlu1 %v2792_v5  ;;  %v2789_v9 = vsel %vm2114_vm3, %v4970_v8, 0.0 }
 0x2a7   : > { %2790 = vadd.xlane.f32.xlu0 %v2789_v9  ;;  %4874 = vmatprep.mubr.msk.f32.mxu0 %vm5050_vm1, %v5049_v2 }
 0x2a8   : > { %4879 = vmatprep.mubr.msk.f32.mxu1 %vm5050_vm1, %v5049_v2  ;;  %4873 = vmatpush3.msra.mxu0 %v410_v10 }
 0x2a9   : > { %4882 = vmatprep.subr.mxu0 %v5049_v2  ;;  %4878 = vmatpush3.msra.mxu1 %v411_v11 }
 0x2aa   : > { %4887 = vmatprep.subr.mxu1 %v5049_v2 }
 0x2f9   : > { %v2773_v12 = vpop.xlane.xlu0 %2772 }
 0x2fa   : > { %4971 = vrcp.f32 %v2773_v12 }
 0x2fd   : > { %v2776_v13 = vpop.xlane.xlu1 %2775 }
 0x2fe   : > { %4973 = vrcp.f32 %v2776_v13 }
 0x307   : > { %v4972_v14 = vpop.eup %4971 }
 0x30b   : > { %v2779_v18 = vpop.xlane.xlu0 %2778  ;;  %v4974_v20 = vpop.eup %4973 }
 0x30c   : > { %4975 = vrcp.f32 %v2779_v18 }
 0x30f   : > { %v2782_v24 = vpop.xlane.xlu1 %2781 }
 0x310   : > { %4977 = vrcp.f32 %v2782_v24 }
 0x319   : > { %v4976_v26 = vpop.eup %4975 }
 0x31d   : > { %v4978_v32 = vpop.eup %4977 }
 0x31e   : > { %v2788_v29 = vpop.xlane.xlu1 %2787 }
 0x31f   : > { %v2785_v31 = vpop.xlane.xlu0 %2784  ;;  %4979 = vrcp.f32 %v2788_v29 }
 0x320   : > { %4981 = vrcp.f32 %v2785_v31 }
 0x32c   : > { %v4980_v36 = vpop.eup %4979 }
 0x32d   : > { %v4982_v38 = vpop.eup %4981 }
 0x32f   : > { %v2864_v15 = vpop.f32.mrf.mxu0  ;;  %v2794_v41 = vpop.xlane.xlu1 %2793 }
 0x330   : > { %v3387_v16 = vmul.f32 %v4972_v14, %v2864_v15  ;;  %v2791_v44 = vpop.xlane.xlu0 %2790  ;;  %4983 = vrcp.f32 %v2794_v41 }
 0x331   : > { %v4836_v19 = vpop.f32.mrf.mxu0  ;;  %4985 = vrcp.f32 %v2791_v44 }
 0x332   : > { %4875 = vmatmul.mubr.msk.f32.vlgmr.msra.gmra.mxu0 %vm2114_vm3, %v3387_v16 }
 0x333   : > { %v2937_v21 = vpop.f32.mrf.mxu1  ;;  %4883 = vmatpush3.msra.mxu0 %v412_v17  ;;  %4884 = vmatprep.mubr.msk.f32.mxu0 %vm5050_vm1, %v5049_v2 }
 0x334   : > { %v3388_v22 = vmul.f32 %v4974_v20, %v2937_v21  ;;  %4892 = vmatprep.subr.mxu0 %v5049_v2 }
 0x335   : > { %v4841_v25 = vpop.f32.mrf.mxu1 }
 0x336   : > { %4880 = vmatmul.mubr.msk.f32.vlgmr.msra.gmra.mxu1 %vm2114_vm3, %v3388_v22 }
 0x337   : > { %4888 = vmatpush3.msra.mxu1 %v413_v23  ;;  %4889 = vmatprep.mubr.msk.f32.mxu1 %vm5050_vm1, %v5049_v2 }
 0x338   : > { %4897 = vmatprep.subr.mxu1 %v5049_v2 }
 0x33d   : > { %v4984_v46 = vpop.eup %4983 }
 0x33e   : > { %v4986_v48 = vpop.eup %4985 }
 0x341   : > { %v3010_v27 = vpop.f32.mrf.mxu0 }
 0x342   : > { %v3389_v28 = vmul.f32 %v4976_v26, %v3010_v27 }
 0x343   : > { %v4846_v30 = vpop.f32.mrf.mxu0 }
 0x344   : > { %4885 = vmatmul.mubr.msk.f32.vlgmr.msra.gmra.mxu0 %vm2114_vm3, %v3389_v28 }
 0x345   : > { %v3083_v33 = vpop.f32.mrf.mxu1  ;;  %4893 = vmatpush3.msra.mxu0 %v410_v10  ;;  %4894 = vmatprep.mubr.msk.f32.mxu0 %vm5050_vm1, %v5049_v2 }
 0x346   : > { %v3390_v34 = vmul.f32 %v4978_v32, %v3083_v33  ;;  %4902 = vmatprep.subr.mxu0 %v5049_v2 }
 0x347   : > { %v4851_v35 = vpop.f32.mrf.mxu1 }
 0x348   : > { %4890 = vmatmul.mubr.msk.f32.vlgmr.msra.gmra.mxu1 %vm2114_vm3, %v3390_v34 }
 0x349   : > { %4898 = vmatpush3.msra.mxu1 %v411_v11  ;;  %4899 = vmatprep.mubr.msk.f32.mxu1 %vm5050_vm1, %v5049_v2 }
 0x34a   : > { %4907 = vmatprep.subr.mxu1 %v5049_v2 }
 0x353   : > { %v3229_v37 = vpop.f32.mrf.mxu1 }
 0x354   : > { %v3156_v39 = vpop.f32.mrf.mxu0  ;;  %v3392_v40 = vmul.f32 %v4980_v36, %v3229_v37 }
 0x355   : > { %v3391_v42 = vmul.f32 %v4982_v38, %v3156_v39  ;;  %v4861_v43 = vpop.f32.mrf.mxu1 }
 0x356   : > { %v4856_v45 = vpop.f32.mrf.mxu0  ;;  %4900 = vmatmul.mubr.msk.f32.vlgmr.msra.gmra.mxu1 %vm2114_vm3, %v3392_v40 }
 0x357   : > { %4895 = vmatmul.mubr.msk.f32.vlgmr.msra.gmra.mxu0 %vm2114_vm3, %v3391_v42  ;;  %4908 = vmatpush3.msra.mxu1 %v413_v23 }
 0x358   : > { %4903 = vmatpush3.msra.mxu0 %v412_v17  ;;  %4904 = vmatprep.mubr.msk.f32.mxu0 %vm5050_vm1, %v5049_v2 }
 0x359   : > { %4909 = vmatprep.mubr.msk.f32.mxu1 %vm5050_vm1, %v5049_v2 }
 0x365   : > { %v3375_v47 = vpop.f32.mrf.mxu1 }
 0x366   : > { %v3302_v49 = vpop.f32.mrf.mxu0  ;;  %v3394_v50 = vmul.f32 %v4984_v46, %v3375_v47 }
 0x367   : > { %v3393_v51 = vmul.f32 %v4986_v48, %v3302_v49  ;;  %v4871_v52 = vpop.f32.mrf.mxu1 }
 0x368   : > { %v4866_v53 = vpop.f32.mrf.mxu0  ;;  %4910 = vmatmul.mubr.msk.f32.vlgmr.msra.gmra.mxu1 %vm2114_vm3, %v3394_v50 }
 0x369   : > { %4905 = vmatmul.mubr.msk.f32.vlgmr.msra.gmra.mxu0 %vm2114_vm3, %v3393_v51 }
 0x3f2   : > { %v3464_v54 = vpop.f32.mrf.mxu0 }
 0x3f3   : > { %v3979_v59 = vsel %vm414_vm0, %v3464_v54, 0.0 }
 0x3f4   : > { %v4876_v55 = vpop.f32.mrf.mxu0 }
 0x3f6   : > { %v3537_v56 = vpop.f32.mrf.mxu1 }
 0x3f7   : > { %v3980_v2 = vsel %vm414_vm0, %v3537_v56, 0.0 }
 0x3f8   : > { %v4881_v57 = vpop.f32.mrf.mxu1  ;;  %v3981_v61 = vadd.f32 %v3980_v2, %v3979_v59 }
 0x404   : > { %v3610_v58 = vpop.f32.mrf.mxu0 }
 0x405   : > { %v3982_v60 = vsel %vm414_vm0, %v3610_v58, 0.0 }
 0x406   : > { %v4886_v62 = vpop.f32.mrf.mxu0  ;;  %v3983_v63 = vadd.f32 %v3982_v60, %v3981_v61 }
 0x408   : > { %v3683_v0 = vpop.f32.mrf.mxu1 }
 0x409   : > { %v3984_v3 = vsel %vm414_vm0, %v3683_v0, 0.0 }
 0x40a   : > { %v3985_v1 = vadd.f32 %v3984_v3, %v3983_v63  ;;  %v4891_v4 = vpop.f32.mrf.mxu1 }
 0x40c   : > { %3993 = vst.msk [vmem:[%s304_s29] sm:$0xff] %vm414_vm0, %v3985_v1 }
 0x416   : > { %v3829_v7 = vpop.f32.mrf.mxu1 }
 0x417   : > { %v3756_v6 = vpop.f32.mrf.mxu0  ;;  %v3987_v10 = vsel %vm414_vm0, %v3829_v7, 0.0 }
 0x418   : > { %v4901_v8 = vpop.f32.mrf.mxu1  ;;  %v3986_v9 = vsel %vm414_vm0, %v3756_v6, 0.0 }
 0x419   : > { %v4896_v5 = vpop.f32.mrf.mxu0  ;;  %v3988_v12 = vadd.f32 %v3987_v10, %v3986_v9 }
 0x428   : > { %v3975_v11 = vpop.f32.mrf.mxu1 }
 0x429   : > { %v3902_v13 = vpop.f32.mrf.mxu0  ;;  %v3991_v18 = vsel %vm414_vm0, %v3975_v11, 0.0 }
 0x42a   : > { %v3989_v14 = vsel %vm414_vm0, %v3902_v13, 0.0  ;;  %v4911_v15 = vpop.f32.mrf.mxu1 }
 0x42b   : > { %v3990_v16 = vadd.f32 %v3989_v14, %v3988_v12  ;;  %v4906_v17 = vpop.f32.mrf.mxu0 }
 0x42d   : > { %v3992_v19 = vadd.f32 %v3991_v18, %v3990_v16 }
 0x42f   : > { %3994 = vst.msk [vmem:[%s304_s29 + $0x8] sm:$0xff] %vm414_vm0, %v3992_v19 }
 0x430   : > { %5000 = shalt.err (!%p4997_p3)
}
 0x431   : > { %s5001_s21 = scalar_lea.hbm %s6086_s15, 256  ;;  %s5005_s20 = scalar_lea.hbm %s6138_s7, 512 }
 0x432   : > { %p5002_p4 = scmp.ne.s32.totalorder %s6086_s15, %s5001_s21  ;;  %p5006_p9 = scmp.lt.s32.totalorder %s6086_s15, %s6138_s7 }
 0x433   : > { %p5007_p10 = scmp.lt.s32.totalorder %s5005_s20, %s5001_s21 }
 0x434   : > { %p5003_p7 = pnand %p5002_p4, %p5132_p5 }
 0x435   : > { %p5008_p11 = por %p5007_p10, %p5006_p9 }
 0x436   : > { %p5004_p8 = pneg %p5003_p7 }
 0x438   : > { %p5009_p12 = pnand %p5008_p11, %p5004_p8 }
 0x43a   : > { %5012 = shalt.err (!%p5009_p12)
}
 0x43b   : > { %s5052_s13 = smov 128   ;;  %s5053_s23 = smov 8  }
 0x43c   : > { %4912 = dma.vmem_to_hbm [thread:$0]  (%p5132_p5), %s6080_s8, 256, %s6086_s15, %s6091_s28, %s5052_s13, %s5052_s13, %s5053_s23  }
 0x43d PF: > { %p4918_p13 = scmp.ge.s32.totalorder %s5047_s27, 2  ;;  %s4024_s16 = sand.u32 1, %s5035_s24  }
 0x43e   : > { %s4025_s18 = scalar_lea.sflag [#allocation3], %s4024_s16 }
 0x43f   : > { %p4915_p0 = pnand %p4918_p13, %p5136_p6 }
 0x441   : > { %p4916_p1 = pneg %p4915_p0 }
 0x443   : > { %5030 = dma.done.wait (%p4916_p1), %s4025_s18, 256  }
 0x444   : > { %5032 = vsyncadd (%p4916_p1), %s4025_s18, 4294967040  ;;  %p17_p2 = scmp.ge.s32.totalorder %s5119_s30, 4   ;;  %s6141_s24 = smov %s5039_s25 }
 0x445   : > { %s6142_s25 = smov %s5043_s26  ;;  %s6143_s26 = smov %s5130_s10 }
 0x446   : > { %s6144_s27 = smov %s5119_s30  ;;  %19 = sbr.rel (!%p17_p2) target bundleno = 3 (0x3), region = 89 }
 0x44b   :  { %4030 = vsyncpa [#allocation3], 1 }
 0x44c   :  { %4032 = vsyncpa [#allocation3 + $0x1], 1 }

</bundles_post_ra>
